<compile_context>
chip_gen: v7x
topology: tpu7x:2x2x1
jax: 0.10.0
libtpu: 0.0.40
codegen_flags: <defaults>
</compile_context>

<pallas_src>
import functools

import jax
import jax.numpy as jnp
from jax.experimental import pallas as pl
from jax.experimental.pallas import tpu as pltpu

# ---- module hyper-parameters (synthetic, small but shape-consistent) --------
VISION_EMBEDDING_DIM = 32
PROPRIOCEPTION_DIM = 8
LATENT_DIM = 16
LAYER_SIZE = 256          # module uses 2048; kept small for this synthetic test
EPSILON = 1.0e-4          # self.epsilon in the PyTorch module
IN_FEATURES = 2 * VISION_EMBEDDING_DIM + PROPRIOCEPTION_DIM  # vision + proprio + goal

LANE = 128
K_PAD = ((IN_FEATURES + LANE - 1) // LANE) * LANE          # 72 -> 128
LATENT_PAD = ((LATENT_DIM + LANE - 1) // LANE) * LANE      # 16 -> 128


def _round_up(x, m):
    return ((x + m - 1) // m) * m


def _vmem_capacity_bytes():
    try:
        return int(pltpu.get_tpu_info().vmem_capacity_bytes)
    except Exception:
        return 64 * 2**20   # conservative: smallest per-TC VMEM across v5e/v6e/v7x


_VMEM_CAP = _vmem_capacity_bytes()


# ----------------------------- Pallas kernel --------------------------------
def plan_proposal_kernel(x_ref, delta_ref,
                         w1, b1, w2, b2, w3, b3, w4, b4, w5, b5,
                         out_ref, *, n_mu_tiles):
    """Path-pure tiles: grid = [mu tiles ; sigma tiles] over the SAME x blocks."""
    is_mu = pl.program_id(0) < n_mu_tiles
    is_sigma = jnp.logical_not(is_mu)

    x = x_ref[...]                                              # (tile, K_PAD) bf16

    # Layer 1 (bf16 MXU, f32 accumulation).  Sigma tiles get the exact f32
    # eps*colsum(W1) contribution of the +eps perturbation added to the
    # pre-activation, so bf16 rounding cannot annihilate it.
    h = jnp.dot(x, w1[...], preferred_element_type=jnp.float32) + b1[...]
    h = h + delta_ref[...] * is_sigma.astype(jnp.float32)
    h = jnp.maximum(h, 0.0).astype(jnp.bfloat16)

    # Hidden layers on the bf16 MXU path, f32 accumulation, f32 bias add.
    for w, b in ((w2, b2), (w3, b3), (w4, b4)):
        h = jnp.dot(h, w[...], preferred_element_type=jnp.float32) + b[...]
        h = jnp.maximum(h, 0.0).astype(jnp.bfloat16)

    # Head (lane-padded to 128 output columns -> lane-dense store).
    z = jnp.dot(h, w5[...], preferred_element_type=jnp.float32) + b5[...]

    @pl.when(is_mu)
    def _():
        out_ref[...] = z.astype(out_ref.dtype)

    @pl.when(is_sigma)
    def _():
        # PyTorch F.softplus (beta=1, threshold=20) -- sigma tiles only.
        sp = jnp.where(z > 20.0, z, jnp.log1p(jnp.exp(jnp.minimum(z, 20.0))))
        out_ref[...] = sp.astype(out_ref.dtype)


# ------------------------------ wrapper --------------------------------------
@functools.partial(jax.jit, static_argnums=(4,))
def _forward(vision_embeded, proprioception, goal_embeded, params,
             single_buffer_weights):
    # Glue (pure layout ops) stays in plain JAX.
    x = jnp.concatenate([vision_embeded, proprioception, goal_embeded],
                        axis=-1).astype(jnp.float32)
    batch = x.shape[0]

    # Tile rows: 256 for large batches (256-wide MXU on v6e/v7x); small batches
    # rounded to a multiple of 16 so the bf16 activations stay sublane-dense.
    tile_rows = 256 if batch >= 256 else _round_up(max(batch, 1), 16)
    n_mu_tiles = pl.cdiv(batch, tile_rows)
    half_rows = n_mu_tiles * tile_rows

    # ONE shared copy of x: mu tiles and sigma tiles index the same blocks.
    xp = jnp.pad(x, ((0, half_rows - batch),
                     (0, K_PAD - IN_FEATURES))).astype(jnp.bfloat16)

    (w1, b1), (w2, b2), (w3, b3), (w4, b4), (w5, b5) = params
    # (x + eps) @ W1 = x @ W1 + eps * colsum(W1); keep the eps term exact in f32.
    delta = (EPSILON * jnp.sum(w1, axis=0, dtype=jnp.float32)).reshape(1, -1)
    # All weights bf16 (MXU-native); zero-padding along K / N is a no-op.
    w1p = jnp.pad(w1, ((0, K_PAD - IN_FEATURES), (0, 0))).astype(jnp.bfloat16)
    w2p, w3p, w4p = (w.astype(jnp.bfloat16) for w in (w2, w3, w4))
    w5p = jnp.pad(w5, ((0, 0), (0, LATENT_PAD - LATENT_DIM))).astype(jnp.bfloat16)
    b5p = jnp.pad(b5, ((0, LATENT_PAD - LATENT_DIM),))
    flat = [delta,
            w1p, b1.reshape(1, -1),
            w2p, b2.reshape(1, -1),
            w3p, b3.reshape(1, -1),
            w4p, b4.reshape(1, -1),
            w5p, b5p.reshape(1, -1)]

    # VMEM budget (generation-aware): (single-)buffered params + double-buffered
    # x/out tiles + headroom for the LAYER_SIZE-wide f32 intermediates.
    param_bytes = sum(int(a.size) * a.dtype.itemsize for a in flat)
    weight_bytes = (1 if single_buffer_weights else 2) * param_bytes
    tile_bytes = 2 * tile_rows * (K_PAD * 2 + LATENT_PAD * 4)
    scratch_bytes = 8 * tile_rows * LAYER_SIZE * 4
    needed = weight_bytes + tile_bytes + scratch_bytes
    vmem_limit = int(min(_VMEM_CAP - 8 * 2**20,
                         max(32 * 2**20, needed + 8 * 2**20)))

    grid = (2 * n_mu_tiles,)
    x_spec = pl.BlockSpec((tile_rows, K_PAD), lambda i: (i % n_mu_tiles, 0))
    if single_buffer_weights:
        # Grid-invariant blocks: a second buffer is pure VMEM waste.
        param_specs = [pl.BlockSpec(a.shape, lambda i: (0, 0),
                                    pipeline_mode=pl.Buffered(1)) for a in flat]
    else:
        param_specs = [pl.BlockSpec(a.shape, lambda i: (0, 0)) for a in flat]
    out_spec = pl.BlockSpec((tile_rows, LATENT_PAD), lambda i: (i, 0))

    # Advisory cost estimate: lets XLA overlap the one-time weight DMA with
    # upstream ops in the small-batch latency case.
    total_rows = 2 * half_rows
    flops = 2 * total_rows * (K_PAD * LAYER_SIZE + 3 * LAYER_SIZE * LAYER_SIZE
                              + LAYER_SIZE * LATENT_PAD)
    cost = pl.CostEstimate(
        flops=int(flops),
        transcendentals=int(2 * half_rows * LATENT_PAD),
        bytes_accessed=int(param_bytes + int(xp.size) * 2
                           + total_rows * LATENT_PAD * 4))

    # Megacore split only when the grid is big enough that compute dominates
    # the per-TC weight DMA (v7x TCs would each re-read the full weight set).
    semantics = ("parallel",) if grid[0] >= 8 else ("arbitrary",)

    kernel = functools.partial(plan_proposal_kernel, n_mu_tiles=n_mu_tiles)
    out = pl.pallas_call(
        kernel,
        grid=grid,
        in_specs=[x_spec] + param_specs,
        out_specs=out_spec,
        out_shape=jax.ShapeDtypeStruct((total_rows, LATENT_PAD), jnp.float32),
        compiler_params=pltpu.CompilerParams(
            dimension_semantics=semantics,
            vmem_limit_bytes=vmem_limit),
        cost_estimate=cost,
    )(xp, *flat)

    mu = out[:batch, :LATENT_DIM]
    sigma = out[half_rows:half_rows + batch, :LATENT_DIM]
    # TODO(synk): torch.distributions.Normal has no Pallas equivalent; the
    # distribution is fully described by (mu, sigma), which we return.
    return mu, sigma


def plan_proposal_forward(vision_embeded, proprioception, goal_embeded, params):
    try:
        return _forward(vision_embeded, proprioception, goal_embeded, params, True)
    except Exception:
        # Runtime without single-buffer (pl.Buffered(1)) support: fall back to
        # default double-buffered weight blocks.
        return _forward(vision_embeded, proprioception, goal_embeded, params, False)


# --------------------- deterministic parameter init --------------------------
def init_params(key):
    """PyTorch nn.Linear default init: U(-1/sqrt(fan_in), 1/sqrt(fan_in))."""
    dims = [IN_FEATURES, LAYER_SIZE, LAYER_SIZE, LAYER_SIZE, LAYER_SIZE, LATENT_DIM]
    params = []
    for i in range(5):
        key, kw, kb = jax.random.split(key, 3)
        bound = 1.0 / jnp.sqrt(dims[i])
        w = jax.random.uniform(kw, (dims[i], dims[i + 1]), jnp.float32, -bound, bound)
        b = jax.random.uniform(kb, (dims[i + 1],), jnp.float32, -bound, bound)
        params.append((w, b))
    return params


# ------------------------------ references -----------------------------------
def reference_matched(vision_embeded, proprioception, goal_embeded, params):
    """Pure-JAX reference with the SAME numerics as the kernel
    (bf16 weights/activations, f32 accumulation, eps via colsum(W1) in f32)."""
    x = jnp.concatenate([vision_embeded, proprioception, goal_embeded],
                        axis=-1).astype(jnp.float32)
    (w1, b1), (w2, b2), (w3, b3), (w4, b4), (w5, b5) = params
    delta = EPSILON * jnp.sum(w1, axis=0, dtype=jnp.float32)
    xb = x.astype(jnp.bfloat16)

    def run(extra):
        h = jnp.dot(xb, w1.astype(jnp.bfloat16),
                    preferred_element_type=jnp.float32) + b1 + extra
        h = jnp.maximum(h, 0.0).astype(jnp.bfloat16)
        for w, bb in ((w2, b2), (w3, b3), (w4, b4)):
            h = jnp.dot(h, w.astype(jnp.bfloat16),
                        preferred_element_type=jnp.float32) + bb
            h = jnp.maximum(h, 0.0).astype(jnp.bfloat16)
        return jnp.dot(h, w5.astype(jnp.bfloat16),
                       preferred_element_type=jnp.float32) + b5

    mu = run(0.0)
    zs = run(delta)
    sigma = jnp.where(zs > 20.0, zs, jnp.log1p(jnp.exp(jnp.minimum(zs, 20.0))))
    return mu, sigma


def reference_f32(vision_embeded, proprioception, goal_embeded, params):
    """Faithful f32 reference of the PyTorch module."""
    x = jnp.concatenate([vision_embeded, proprioception, goal_embeded], axis=-1)

    def mlp(h):
        for i, (w, b) in enumerate(params):
            h = h @ w + b
            if i < 4:
                h = jnp.maximum(h, 0.0)
        return h

    mu = mlp(x)
    z = mlp(x + EPSILON)
    sigma = jnp.where(z > 20.0, z, jnp.log1p(jnp.exp(jnp.minimum(z, 20.0))))
    return mu, sigma


# --------------------------------- main ---------------------------------------
if __name__ == "__main__":
    key = jax.random.PRNGKey(0)
    kp, kv, kprop, kg = jax.random.split(key, 4)

    batch = 2
    params = init_params(kp)
    vision_embeded = jax.random.normal(kv, (batch, VISION_EMBEDDING_DIM), jnp.float32)
    proprioception = jax.random.normal(kprop, (batch, PROPRIOCEPTION_DIM), jnp.float32)
    goal_embeded = jax.random.normal(kg, (batch, VISION_EMBEDDING_DIM), jnp.float32)

    mu, sigma = plan_proposal_forward(vision_embeded, proprioception, goal_embeded, params)
    jax.block_until_ready((mu, sigma))

    # Same-numerics reference (bf16 path, f32 accumulation, f32 eps term).
    mu_m, sigma_m = reference_matched(vision_embeded, proprioception, goal_embeded, params)
    assert jnp.allclose(mu, mu_m, atol=5e-3, rtol=5e-3)
    assert jnp.allclose(sigma, sigma_m, atol=5e-3, rtol=5e-3)

    # Faithful f32 reference (tolerance sized for the five bf16 layers).
    mu_f, sigma_f = reference_f32(vision_embeded, proprioception, goal_embeded, params)
    assert jnp.allclose(mu, mu_f, atol=5e-2, rtol=5e-2)
    assert jnp.allclose(sigma, sigma_f, atol=5e-2, rtol=5e-2)

    assert bool(jnp.all(sigma > 0.0))  # valid Normal scale
    assert mu.shape == (batch, LATENT_DIM) and sigma.shape == (batch, LATENT_DIM)

    print("KERNEL_OK")
</pallas_src>

<mosaic_0001>
module attributes {stable_mosaic.version = 11 : i64} {
  func.func @plan_proposal_kernel(%arg0: i32, %arg1: memref<16x128xbf16, #tpu.memory_space<vmem>>, %arg2: memref<1x256xf32, #tpu.memory_space<vmem>>, %arg3: memref<128x256xbf16, #tpu.memory_space<vmem>>, %arg4: memref<1x256xf32, #tpu.memory_space<vmem>>, %arg5: memref<256x256xbf16, #tpu.memory_space<vmem>>, %arg6: memref<1x256xf32, #tpu.memory_space<vmem>>, %arg7: memref<256x256xbf16, #tpu.memory_space<vmem>>, %arg8: memref<1x256xf32, #tpu.memory_space<vmem>>, %arg9: memref<256x256xbf16, #tpu.memory_space<vmem>>, %arg10: memref<1x256xf32, #tpu.memory_space<vmem>>, %arg11: memref<256x128xbf16, #tpu.memory_space<vmem>>, %arg12: memref<1x128xf32, #tpu.memory_space<vmem>>, %arg13: memref<16x128xf32, #tpu.memory_space<vmem>>) attributes {dimension_semantics = [#tpu.dimension_semantics<arbitrary>], iteration_bounds = array<i64: 2>, scalar_prefetch = 0 : i64, scratch_operands = 0 : i64, tpu.core_type = #tpu.core_type<tc>, window_params = [{transform_indices = @transform_0, window_bounds = array<i64: 16, 128>}, {pipeline_mode = #tpu.pipeline_mode<synchronous>, transform_indices = @transform_1, window_bounds = array<i64: 1, 256>}, {pipeline_mode = #tpu.pipeline_mode<synchronous>, transform_indices = @transform_2, window_bounds = array<i64: 128, 256>}, {pipeline_mode = #tpu.pipeline_mode<synchronous>, transform_indices = @transform_3, window_bounds = array<i64: 1, 256>}, {pipeline_mode = #tpu.pipeline_mode<synchronous>, transform_indices = @transform_4, window_bounds = array<i64: 256, 256>}, {pipeline_mode = #tpu.pipeline_mode<synchronous>, transform_indices = @transform_5, window_bounds = array<i64: 1, 256>}, {pipeline_mode = #tpu.pipeline_mode<synchronous>, transform_indices = @transform_6, window_bounds = array<i64: 256, 256>}, {pipeline_mode = #tpu.pipeline_mode<synchronous>, transform_indices = @transform_7, window_bounds = array<i64: 1, 256>}, {pipeline_mode = #tpu.pipeline_mode<synchronous>, transform_indices = @transform_8, window_bounds = array<i64: 256, 256>}, {pipeline_mode = #tpu.pipeline_mode<synchronous>, transform_indices = @transform_9, window_bounds = array<i64: 1, 256>}, {pipeline_mode = #tpu.pipeline_mode<synchronous>, transform_indices = @transform_10, window_bounds = array<i64: 256, 128>}, {pipeline_mode = #tpu.pipeline_mode<synchronous>, transform_indices = @transform_11, window_bounds = array<i64: 1, 128>}, {transform_indices = @transform_12, window_bounds = array<i64: 16, 128>}]} {
    %c1_i32 = arith.constant 1 : i32
    %0 = arith.cmpi slt, %arg0, %c1_i32 : i32
    %true = arith.constant true
    %1 = arith.xori %0, %true : i1
    %c0 = arith.constant 0 : index
    %c0_0 = arith.constant 0 : index
    %2 = vector.load %arg1[%c0, %c0_0] : memref<16x128xbf16, #tpu.memory_space<vmem>>, vector<16x128xbf16>
    %c0_1 = arith.constant 0 : index
    %c0_2 = arith.constant 0 : index
    %3 = vector.load %arg3[%c0_1, %c0_2] : memref<128x256xbf16, #tpu.memory_space<vmem>>, vector<128x256xbf16>
    %cst = arith.constant dense<0.000000e+00> : vector<16x256xf32>
    %4 = tpu.matmul %2, %3, %cst {dimension_numbers = #tpu.dot_dimension_numbers<[1], [0], [0], [1], [0, 0, 1, 1], [], []>} : vector<16x128xbf16>, vector<128x256xbf16>, vector<16x256xf32> -> vector<16x256xf32>
    %c0_3 = arith.constant 0 : index
    %c0_4 = arith.constant 0 : index
    %5 = vector.load %arg4[%c0_3, %c0_4] : memref<1x256xf32, #tpu.memory_space<vmem>>, vector<1x256xf32>
    %6 = vector.broadcast %5 : vector<1x256xf32> to vector<16x256xf32>
    %7 = arith.addf %4, %6 : vector<16x256xf32>
    %c0_5 = arith.constant 0 : index
    %c0_6 = arith.constant 0 : index
    %8 = vector.load %arg2[%c0_5, %c0_6] : memref<1x256xf32, #tpu.memory_space<vmem>>, vector<1x256xf32>
    %9 = arith.extui %1 : i1 to i32
    %10 = arith.sitofp %9 : i32 to f32
    %11 = vector.broadcast %10 : f32 to vector<1x256xf32>
    %12 = arith.mulf %8, %11 : vector<1x256xf32>
    %13 = vector.broadcast %12 : vector<1x256xf32> to vector<16x256xf32>
    %14 = arith.addf %7, %13 : vector<16x256xf32>
    %cst_7 = arith.constant 0.000000e+00 : f32
    %15 = vector.broadcast %cst_7 : f32 to vector<16x256xf32>
    %16 = arith.maximumf %14, %15 : vector<16x256xf32>
    %17 = arith.truncf %16 : vector<16x256xf32> to vector<16x256xbf16>
    %c0_8 = arith.constant 0 : index
    %c0_9 = arith.constant 0 : index
    %18 = vector.load %arg5[%c0_8, %c0_9] : memref<256x256xbf16, #tpu.memory_space<vmem>>, vector<256x256xbf16>
    %cst_10 = arith.constant dense<0.000000e+00> : vector<16x256xf32>
    %19 = tpu.matmul %17, %18, %cst_10 {dimension_numbers = #tpu.dot_dimension_numbers<[1], [0], [0], [1], [0, 0, 1, 1], [], []>} : vector<16x256xbf16>, vector<256x256xbf16>, vector<16x256xf32> -> vector<16x256xf32>
    %c0_11 = arith.constant 0 : index
    %c0_12 = arith.constant 0 : index
    %20 = vector.load %arg6[%c0_11, %c0_12] : memref<1x256xf32, #tpu.memory_space<vmem>>, vector<1x256xf32>
    %21 = vector.broadcast %20 : vector<1x256xf32> to vector<16x256xf32>
    %22 = arith.addf %19, %21 : vector<16x256xf32>
    %cst_13 = arith.constant 0.000000e+00 : f32
    %23 = vector.broadcast %cst_13 : f32 to vector<16x256xf32>
    %24 = arith.maximumf %22, %23 : vector<16x256xf32>
    %25 = arith.truncf %24 : vector<16x256xf32> to vector<16x256xbf16>
    %c0_14 = arith.constant 0 : index
    %c0_15 = arith.constant 0 : index
    %26 = vector.load %arg7[%c0_14, %c0_15] : memref<256x256xbf16, #tpu.memory_space<vmem>>, vector<256x256xbf16>
    %cst_16 = arith.constant dense<0.000000e+00> : vector<16x256xf32>
    %27 = tpu.matmul %25, %26, %cst_16 {dimension_numbers = #tpu.dot_dimension_numbers<[1], [0], [0], [1], [0, 0, 1, 1], [], []>} : vector<16x256xbf16>, vector<256x256xbf16>, vector<16x256xf32> -> vector<16x256xf32>
    %c0_17 = arith.constant 0 : index
    %c0_18 = arith.constant 0 : index
    %28 = vector.load %arg8[%c0_17, %c0_18] : memref<1x256xf32, #tpu.memory_space<vmem>>, vector<1x256xf32>
    %29 = vector.broadcast %28 : vector<1x256xf32> to vector<16x256xf32>
    %30 = arith.addf %27, %29 : vector<16x256xf32>
    %cst_19 = arith.constant 0.000000e+00 : f32
    %31 = vector.broadcast %cst_19 : f32 to vector<16x256xf32>
    %32 = arith.maximumf %30, %31 : vector<16x256xf32>
    %33 = arith.truncf %32 : vector<16x256xf32> to vector<16x256xbf16>
    %c0_20 = arith.constant 0 : index
    %c0_21 = arith.constant 0 : index
    %34 = vector.load %arg9[%c0_20, %c0_21] : memref<256x256xbf16, #tpu.memory_space<vmem>>, vector<256x256xbf16>
    %cst_22 = arith.constant dense<0.000000e+00> : vector<16x256xf32>
    %35 = tpu.matmul %33, %34, %cst_22 {dimension_numbers = #tpu.dot_dimension_numbers<[1], [0], [0], [1], [0, 0, 1, 1], [], []>} : vector<16x256xbf16>, vector<256x256xbf16>, vector<16x256xf32> -> vector<16x256xf32>
    %c0_23 = arith.constant 0 : index
    %c0_24 = arith.constant 0 : index
    %36 = vector.load %arg10[%c0_23, %c0_24] : memref<1x256xf32, #tpu.memory_space<vmem>>, vector<1x256xf32>
    %37 = vector.broadcast %36 : vector<1x256xf32> to vector<16x256xf32>
    %38 = arith.addf %35, %37 : vector<16x256xf32>
    %cst_25 = arith.constant 0.000000e+00 : f32
    %39 = vector.broadcast %cst_25 : f32 to vector<16x256xf32>
    %40 = arith.maximumf %38, %39 : vector<16x256xf32>
    %41 = arith.truncf %40 : vector<16x256xf32> to vector<16x256xbf16>
    %c0_26 = arith.constant 0 : index
    %c0_27 = arith.constant 0 : index
    %42 = vector.load %arg11[%c0_26, %c0_27] : memref<256x128xbf16, #tpu.memory_space<vmem>>, vector<256x128xbf16>
    %cst_28 = arith.constant dense<0.000000e+00> : vector<16x128xf32>
    %43 = tpu.matmul %41, %42, %cst_28 {dimension_numbers = #tpu.dot_dimension_numbers<[1], [0], [0], [1], [0, 0, 1, 1], [], []>} : vector<16x256xbf16>, vector<256x128xbf16>, vector<16x128xf32> -> vector<16x128xf32>
    %c0_29 = arith.constant 0 : index
    %c0_30 = arith.constant 0 : index
    %44 = vector.load %arg12[%c0_29, %c0_30] : memref<1x128xf32, #tpu.memory_space<vmem>>, vector<1x128xf32>
    %45 = vector.broadcast %44 : vector<1x128xf32> to vector<16x128xf32>
    %46 = arith.addf %43, %45 : vector<16x128xf32>
    %47 = arith.extui %0 : i1 to i32
    %c0_i32 = arith.constant 0 : i32
    %48 = arith.cmpi ne, %47, %c0_i32 : i32
    scf.if %48 {
      %c0_32 = arith.constant 0 : index
      %c0_33 = arith.constant 0 : index
      %51 = vector.load %arg13[%c0_32, %c0_33] : memref<16x128xf32, #tpu.memory_space<vmem>>, vector<16x128xf32>
      tpu.vector_store %arg13[%c0_32, %c0_33], %46 {strides = array<i32>} : memref<16x128xf32, #tpu.memory_space<vmem>>, vector<16x128xf32>,
    } else {
    }
    %49 = arith.extui %1 : i1 to i32
    %c0_i32_31 = arith.constant 0 : i32
    %50 = arith.cmpi ne, %49, %c0_i32_31 : i32
    scf.if %50 {
      %cst_32 = arith.constant 2.000000e+01 : f32
      %51 = vector.broadcast %cst_32 : f32 to vector<16x128xf32>
      %52 = arith.cmpf ogt, %46, %51 : vector<16x128xf32>
      %cst_33 = arith.constant 2.000000e+01 : f32
      %53 = vector.broadcast %cst_33 : f32 to vector<16x128xf32>
      %54 = arith.minimumf %46, %53 : vector<16x128xf32>
      %55 = math.exp %54 : vector<16x128xf32>
      %56 = math.log1p %55 : vector<16x128xf32>
      %57 = arith.select %52, %46, %56 : vector<16x128xi1>, vector<16x128xf32>
      %c0_34 = arith.constant 0 : index
      %c0_35 = arith.constant 0 : index
      %58 = vector.load %arg13[%c0_34, %c0_35] : memref<16x128xf32, #tpu.memory_space<vmem>>, vector<16x128xf32>
      tpu.vector_store %arg13[%c0_34, %c0_35], %57 {strides = array<i32>} : memref<16x128xf32, #tpu.memory_space<vmem>>, vector<16x128xf32>,
    } else {
    }
    return
  }
  func.func @transform_0(%arg0: i32) -> (i32, i32) {
    %c1_i32 = arith.constant 1 : i32
    %c0_i32 = arith.constant 0 : i32
    %0 = arith.cmpi eq, %c1_i32, %c0_i32 : i32
    %c1_i32_0 = arith.constant 1 : i32
    %1 = arith.select %0, %c1_i32_0, %c1_i32 : i32
    %2 = arith.remsi %arg0, %1 : i32
    %c0_i32_1 = arith.constant 0 : i32
    %3 = arith.cmpi ne, %2, %c0_i32_1 : i32
    %c0_i32_2 = arith.constant 0 : i32
    %4 = arith.cmpi slt, %2, %c0_i32_2 : i32
    %c0_i32_3 = arith.constant 0 : i32
    %5 = arith.cmpi slt, %1, %c0_i32_3 : i32
    %6 = arith.xori %4, %5 : i1
    %7 = arith.andi %6, %3 : i1
    %8 = arith.addi %2, %1 : i32
    %9 = arith.select %7, %8, %2 : i32
    %c0_i32_4 = arith.constant 0 : i32
    %c0_i32_5 = arith.constant 0 : i32
    return %9, %c0_i32_4 : i32, i32
  }
  func.func @transform_1(%arg0: i32) -> (i32, i32) {
    %c0_i32 = arith.constant 0 : i32
    %c0_i32_0 = arith.constant 0 : i32
    %c0_i32_1 = arith.constant 0 : i32
    return %c0_i32, %c0_i32_0 : i32, i32
  }
  func.func @transform_2(%arg0: i32) -> (i32, i32) {
    %c0_i32 = arith.constant 0 : i32
    %c0_i32_0 = arith.constant 0 : i32
    %c0_i32_1 = arith.constant 0 : i32
    return %c0_i32, %c0_i32_0 : i32, i32
  }
  func.func @transform_3(%arg0: i32) -> (i32, i32) {
    %c0_i32 = arith.constant 0 : i32
    %c0_i32_0 = arith.constant 0 : i32
    %c0_i32_1 = arith.constant 0 : i32
    return %c0_i32, %c0_i32_0 : i32, i32
  }
  func.func @transform_4(%arg0: i32) -> (i32, i32) {
    %c0_i32 = arith.constant 0 : i32
    %c0_i32_0 = arith.constant 0 : i32
    %c0_i32_1 = arith.constant 0 : i32
    return %c0_i32, %c0_i32_0 : i32, i32
  }
  func.func @transform_5(%arg0: i32) -> (i32, i32) {
    %c0_i32 = arith.constant 0 : i32
    %c0_i32_0 = arith.constant 0 : i32
    %c0_i32_1 = arith.constant 0 : i32
    return %c0_i32, %c0_i32_0 : i32, i32
  }
  func.func @transform_6(%arg0: i32) -> (i32, i32) {
    %c0_i32 = arith.constant 0 : i32
    %c0_i32_0 = arith.constant 0 : i32
    %c0_i32_1 = arith.constant 0 : i32
    return %c0_i32, %c0_i32_0 : i32, i32
  }
  func.func @transform_7(%arg0: i32) -> (i32, i32) {
    %c0_i32 = arith.constant 0 : i32
    %c0_i32_0 = arith.constant 0 : i32
    %c0_i32_1 = arith.constant 0 : i32
    return %c0_i32, %c0_i32_0 : i32, i32
  }
  func.func @transform_8(%arg0: i32) -> (i32, i32) {
    %c0_i32 = arith.constant 0 : i32
    %c0_i32_0 = arith.constant 0 : i32
    %c0_i32_1 = arith.constant 0 : i32
    return %c0_i32, %c0_i32_0 : i32, i32
  }
  func.func @transform_9(%arg0: i32) -> (i32, i32) {
    %c0_i32 = arith.constant 0 : i32
    %c0_i32_0 = arith.constant 0 : i32
    %c0_i32_1 = arith.constant 0 : i32
    return %c0_i32, %c0_i32_0 : i32, i32
  }
  func.func @transform_10(%arg0: i32) -> (i32, i32) {
    %c0_i32 = arith.constant 0 : i32
    %c0_i32_0 = arith.constant 0 : i32
    %c0_i32_1 = arith.constant 0 : i32
    return %c0_i32, %c0_i32_0 : i32, i32
  }
  func.func @transform_11(%arg0: i32) -> (i32, i32) {
    %c0_i32 = arith.constant 0 : i32
    %c0_i32_0 = arith.constant 0 : i32
    %c0_i32_1 = arith.constant 0 : i32
    return %c0_i32, %c0_i32_0 : i32, i32
  }
  func.func @transform_12(%arg0: i32) -> (i32, i32) {
    %c0_i32 = arith.constant 0 : i32
    %c0_i32_0 = arith.constant 0 : i32
    return %arg0, %c0_i32 : i32, i32
  }
}

module attributes {stable_mosaic.version = 11 : i64} {
  func.func @plan_proposal_kernel(%arg0: i32, %arg1: memref<16x128xbf16, #tpu.memory_space<vmem>>, %arg2: memref<1x256xf32, #tpu.memory_space<vmem>>, %arg3: memref<128x256xbf16, #tpu.memory_space<vmem>>, %arg4: memref<1x256xf32, #tpu.memory_space<vmem>>, %arg5: memref<256x256xbf16, #tpu.memory_space<vmem>>, %arg6: memref<1x256xf32, #tpu.memory_space<vmem>>, %arg7: memref<256x256xbf16, #tpu.memory_space<vmem>>, %arg8: memref<1x256xf32, #tpu.memory_space<vmem>>, %arg9: memref<256x256xbf16, #tpu.memory_space<vmem>>, %arg10: memref<1x256xf32, #tpu.memory_space<vmem>>, %arg11: memref<256x128xbf16, #tpu.memory_space<vmem>>, %arg12: memref<1x128xf32, #tpu.memory_space<vmem>>, %arg13: memref<16x128xf32, #tpu.memory_space<vmem>>) attributes {dimension_semantics = [#tpu.dimension_semantics<arbitrary>], iteration_bounds = array<i64: 2>, scalar_prefetch = 0 : i64, scratch_operands = 0 : i64, tpu.core_type = #tpu.core_type<tc>, window_params = [{transform_indices = @transform_0, window_bounds = array<i64: 16, 128>}, {pipeline_mode = #tpu.pipeline_mode<synchronous>, transform_indices = @transform_1, window_bounds = array<i64: 1, 256>}, {pipeline_mode = #tpu.pipeline_mode<synchronous>, transform_indices = @transform_2, window_bounds = array<i64: 128, 256>}, {pipeline_mode = #tpu.pipeline_mode<synchronous>, transform_indices = @transform_3, window_bounds = array<i64: 1, 256>}, {pipeline_mode = #tpu.pipeline_mode<synchronous>, transform_indices = @transform_4, window_bounds = array<i64: 256, 256>}, {pipeline_mode = #tpu.pipeline_mode<synchronous>, transform_indices = @transform_5, window_bounds = array<i64: 1, 256>}, {pipeline_mode = #tpu.pipeline_mode<synchronous>, transform_indices = @transform_6, window_bounds = array<i64: 256, 256>}, {pipeline_mode = #tpu.pipeline_mode<synchronous>, transform_indices = @transform_7, window_bounds = array<i64: 1, 256>}, {pipeline_mode = #tpu.pipeline_mode<synchronous>, transform_indices = @transform_8, window_bounds = array<i64: 256, 256>}, {pipeline_mode = #tpu.pipeline_mode<synchronous>, transform_indices = @transform_9, window_bounds = array<i64: 1, 256>}, {pipeline_mode = #tpu.pipeline_mode<synchronous>, transform_indices = @transform_10, window_bounds = array<i64: 256, 128>}, {pipeline_mode = #tpu.pipeline_mode<synchronous>, transform_indices = @transform_11, window_bounds = array<i64: 1, 128>}, {transform_indices = @transform_12, window_bounds = array<i64: 16, 128>}]} {
    %c1_i32 = arith.constant 1 : i32
    %0 = arith.cmpi slt, %arg0, %c1_i32 : i32
    %true = arith.constant true
    %1 = arith.xori %0, %true : i1
    %c0 = arith.constant 0 : index
    %c0_0 = arith.constant 0 : index
    %2 = vector.load %arg1[%c0, %c0_0] : memref<16x128xbf16, #tpu.memory_space<vmem>>, vector<16x128xbf16>
    %c0_1 = arith.constant 0 : index
    %c0_2 = arith.constant 0 : index
    %3 = vector.load %arg3[%c0_1, %c0_2] : memref<128x256xbf16, #tpu.memory_space<vmem>>, vector<128x256xbf16>
    %cst = arith.constant dense<0.000000e+00> : vector<16x256xf32>
    %4 = tpu.matmul %2, %3, %cst {dimension_numbers = #tpu.dot_dimension_numbers<[1], [0], [0], [1], [0, 0, 1, 1], [], []>} : vector<16x128xbf16>, vector<128x256xbf16>, vector<16x256xf32> -> vector<16x256xf32>
    %c0_3 = arith.constant 0 : index
    %c0_4 = arith.constant 0 : index
    %5 = vector.load %arg4[%c0_3, %c0_4] : memref<1x256xf32, #tpu.memory_space<vmem>>, vector<1x256xf32>
    %6 = vector.broadcast %5 : vector<1x256xf32> to vector<16x256xf32>
    %7 = arith.addf %4, %6 : vector<16x256xf32>
    %c0_5 = arith.constant 0 : index
    %c0_6 = arith.constant 0 : index
    %8 = vector.load %arg2[%c0_5, %c0_6] : memref<1x256xf32, #tpu.memory_space<vmem>>, vector<1x256xf32>
    %9 = arith.extui %1 : i1 to i32
    %10 = arith.sitofp %9 : i32 to f32
    %11 = vector.broadcast %10 : f32 to vector<1x256xf32>
    %12 = arith.mulf %8, %11 : vector<1x256xf32>
    %13 = vector.broadcast %12 : vector<1x256xf32> to vector<16x256xf32>
    %14 = arith.addf %7, %13 : vector<16x256xf32>
    %cst_7 = arith.constant 0.000000e+00 : f32
    %15 = vector.broadcast %cst_7 : f32 to vector<16x256xf32>
    %16 = arith.maximumf %14, %15 : vector<16x256xf32>
    %17 = arith.truncf %16 : vector<16x256xf32> to vector<16x256xbf16>
    %c0_8 = arith.constant 0 : index
    %c0_9 = arith.constant 0 : index
    %18 = vector.load %arg5[%c0_8, %c0_9] : memref<256x256xbf16, #tpu.memory_space<vmem>>, vector<256x256xbf16>
    %cst_10 = arith.constant dense<0.000000e+00> : vector<16x256xf32>
    %19 = tpu.matmul %17, %18, %cst_10 {dimension_numbers = #tpu.dot_dimension_numbers<[1], [0], [0], [1], [0, 0, 1, 1], [], []>} : vector<16x256xbf16>, vector<256x256xbf16>, vector<16x256xf32> -> vector<16x256xf32>
    %c0_11 = arith.constant 0 : index
    %c0_12 = arith.constant 0 : index
    %20 = vector.load %arg6[%c0_11, %c0_12] : memref<1x256xf32, #tpu.memory_space<vmem>>, vector<1x256xf32>
    %21 = vector.broadcast %20 : vector<1x256xf32> to vector<16x256xf32>
    %22 = arith.addf %19, %21 : vector<16x256xf32>
    %cst_13 = arith.constant 0.000000e+00 : f32
    %23 = vector.broadcast %cst_13 : f32 to vector<16x256xf32>
    %24 = arith.maximumf %22, %23 : vector<16x256xf32>
    %25 = arith.truncf %24 : vector<16x256xf32> to vector<16x256xbf16>
    %c0_14 = arith.constant 0 : index
    %c0_15 = arith.constant 0 : index
    %26 = vector.load %arg7[%c0_14, %c0_15] : memref<256x256xbf16, #tpu.memory_space<vmem>>, vector<256x256xbf16>
    %cst_16 = arith.constant dense<0.000000e+00> : vector<16x256xf32>
    %27 = tpu.matmul %25, %26, %cst_16 {dimension_numbers = #tpu.dot_dimension_numbers<[1], [0], [0], [1], [0, 0, 1, 1], [], []>} : vector<16x256xbf16>, vector<256x256xbf16>, vector<16x256xf32> -> vector<16x256xf32>
    %c0_17 = arith.constant 0 : index
    %c0_18 = arith.constant 0 : index
    %28 = vector.load %arg8[%c0_17, %c0_18] : memref<1x256xf32, #tpu.memory_space<vmem>>, vector<1x256xf32>
    %29 = vector.broadcast %28 : vector<1x256xf32> to vector<16x256xf32>
    %30 = arith.addf %27, %29 : vector<16x256xf32>
    %cst_19 = arith.constant 0.000000e+00 : f32
    %31 = vector.broadcast %cst_19 : f32 to vector<16x256xf32>
    %32 = arith.maximumf %30, %31 : vector<16x256xf32>
    %33 = arith.truncf %32 : vector<16x256xf32> to vector<16x256xbf16>
    %c0_20 = arith.constant 0 : index
    %c0_21 = arith.constant 0 : index
    %34 = vector.load %arg9[%c0_20, %c0_21] : memref<256x256xbf16, #tpu.memory_space<vmem>>, vector<256x256xbf16>
    %cst_22 = arith.constant dense<0.000000e+00> : vector<16x256xf32>
    %35 = tpu.matmul %33, %34, %cst_22 {dimension_numbers = #tpu.dot_dimension_numbers<[1], [0], [0], [1], [0, 0, 1, 1], [], []>} : vector<16x256xbf16>, vector<256x256xbf16>, vector<16x256xf32> -> vector<16x256xf32>
    %c0_23 = arith.constant 0 : index
    %c0_24 = arith.constant 0 : index
    %36 = vector.load %arg10[%c0_23, %c0_24] : memref<1x256xf32, #tpu.memory_space<vmem>>, vector<1x256xf32>
    %37 = vector.broadcast %36 : vector<1x256xf32> to vector<16x256xf32>
    %38 = arith.addf %35, %37 : vector<16x256xf32>
    %cst_25 = arith.constant 0.000000e+00 : f32
    %39 = vector.broadcast %cst_25 : f32 to vector<16x256xf32>
    %40 = arith.maximumf %38, %39 : vector<16x256xf32>
    %41 = arith.truncf %40 : vector<16x256xf32> to vector<16x256xbf16>
    %c0_26 = arith.constant 0 : index
    %c0_27 = arith.constant 0 : index
    %42 = vector.load %arg11[%c0_26, %c0_27] : memref<256x128xbf16, #tpu.memory_space<vmem>>, vector<256x128xbf16>
    %cst_28 = arith.constant dense<0.000000e+00> : vector<16x128xf32>
    %43 = tpu.matmul %41, %42, %cst_28 {dimension_numbers = #tpu.dot_dimension_numbers<[1], [0], [0], [1], [0, 0, 1, 1], [], []>} : vector<16x256xbf16>, vector<256x128xbf16>, vector<16x128xf32> -> vector<16x128xf32>
    %c0_29 = arith.constant 0 : index
    %c0_30 = arith.constant 0 : index
    %44 = vector.load %arg12[%c0_29, %c0_30] : memref<1x128xf32, #tpu.memory_space<vmem>>, vector<1x128xf32>
    %45 = vector.broadcast %44 : vector<1x128xf32> to vector<16x128xf32>
    %46 = arith.addf %43, %45 : vector<16x128xf32>
    %47 = arith.extui %0 : i1 to i32
    %c0_i32 = arith.constant 0 : i32
    %48 = arith.cmpi ne, %47, %c0_i32 : i32
    scf.if %48 {
      %c0_32 = arith.constant 0 : index
      %c0_33 = arith.constant 0 : index
      %51 = vector.load %arg13[%c0_32, %c0_33] : memref<16x128xf32, #tpu.memory_space<vmem>>, vector<16x128xf32>
      tpu.vector_store %arg13[%c0_32, %c0_33], %46 {strides = array<i32>} : memref<16x128xf32, #tpu.memory_space<vmem>>, vector<16x128xf32>,
    } else {
    }
    %49 = arith.extui %1 : i1 to i32
    %c0_i32_31 = arith.constant 0 : i32
    %50 = arith.cmpi ne, %49, %c0_i32_31 : i32
    scf.if %50 {
      %cst_32 = arith.constant 2.000000e+01 : f32
      %51 = vector.broadcast %cst_32 : f32 to vector<16x128xf32>
      %52 = arith.cmpf ogt, %46, %51 : vector<16x128xf32>
      %cst_33 = arith.constant 2.000000e+01 : f32
      %53 = vector.broadcast %cst_33 : f32 to vector<16x128xf32>
      %54 = arith.minimumf %46, %53 : vector<16x128xf32>
      %55 = math.exp %54 : vector<16x128xf32>
      %56 = math.log1p %55 : vector<16x128xf32>
      %57 = arith.select %52, %46, %56 : vector<16x128xi1>, vector<16x128xf32>
      %c0_34 = arith.constant 0 : index
      %c0_35 = arith.constant 0 : index
      %58 = vector.load %arg13[%c0_34, %c0_35] : memref<16x128xf32, #tpu.memory_space<vmem>>, vector<16x128xf32>
      tpu.vector_store %arg13[%c0_34, %c0_35], %57 {strides = array<i32>} : memref<16x128xf32, #tpu.memory_space<vmem>>, vector<16x128xf32>,
    } else {
    }
    return
  }
  func.func @transform_0(%arg0: i32) -> (i32, i32) {
    %c1_i32 = arith.constant 1 : i32
    %c0_i32 = arith.constant 0 : i32
    %0 = arith.cmpi eq, %c1_i32, %c0_i32 : i32
    %c1_i32_0 = arith.constant 1 : i32
    %1 = arith.select %0, %c1_i32_0, %c1_i32 : i32
    %2 = arith.remsi %arg0, %1 : i32
    %c0_i32_1 = arith.constant 0 : i32
    %3 = arith.cmpi ne, %2, %c0_i32_1 : i32
    %c0_i32_2 = arith.constant 0 : i32
    %4 = arith.cmpi slt, %2, %c0_i32_2 : i32
    %c0_i32_3 = arith.constant 0 : i32
    %5 = arith.cmpi slt, %1, %c0_i32_3 : i32
    %6 = arith.xori %4, %5 : i1
    %7 = arith.andi %6, %3 : i1
    %8 = arith.addi %2, %1 : i32
    %9 = arith.select %7, %8, %2 : i32
    %c0_i32_4 = arith.constant 0 : i32
    %c0_i32_5 = arith.constant 0 : i32
    return %9, %c0_i32_4 : i32, i32
  }
  func.func @transform_1(%arg0: i32) -> (i32, i32) {
    %c0_i32 = arith.constant 0 : i32
    %c0_i32_0 = arith.constant 0 : i32
    %c0_i32_1 = arith.constant 0 : i32
    return %c0_i32, %c0_i32_0 : i32, i32
  }
  func.func @transform_2(%arg0: i32) -> (i32, i32) {
    %c0_i32 = arith.constant 0 : i32
    %c0_i32_0 = arith.constant 0 : i32
    %c0_i32_1 = arith.constant 0 : i32
    return %c0_i32, %c0_i32_0 : i32, i32
  }
  func.func @transform_3(%arg0: i32) -> (i32, i32) {
    %c0_i32 = arith.constant 0 : i32
    %c0_i32_0 = arith.constant 0 : i32
    %c0_i32_1 = arith.constant 0 : i32
    return %c0_i32, %c0_i32_0 : i32, i32
  }
  func.func @transform_4(%arg0: i32) -> (i32, i32) {
    %c0_i32 = arith.constant 0 : i32
    %c0_i32_0 = arith.constant 0 : i32
    %c0_i32_1 = arith.constant 0 : i32
    return %c0_i32, %c0_i32_0 : i32, i32
  }
  func.func @transform_5(%arg0: i32) -> (i32, i32) {
    %c0_i32 = arith.constant 0 : i32
    %c0_i32_0 = arith.constant 0 : i32
    %c0_i32_1 = arith.constant 0 : i32
    return %c0_i32, %c0_i32_0 : i32, i32
  }
  func.func @transform_6(%arg0: i32) -> (i32, i32) {
    %c0_i32 = arith.constant 0 : i32
    %c0_i32_0 = arith.constant 0 : i32
    %c0_i32_1 = arith.constant 0 : i32
    return %c0_i32, %c0_i32_0 : i32, i32
  }
  func.func @transform_7(%arg0: i32) -> (i32, i32) {
    %c0_i32 = arith.constant 0 : i32
    %c0_i32_0 = arith.constant 0 : i32
    %c0_i32_1 = arith.constant 0 : i32
    return %c0_i32, %c0_i32_0 : i32, i32
  }
  func.func @transform_8(%arg0: i32) -> (i32, i32) {
    %c0_i32 = arith.constant 0 : i32
    %c0_i32_0 = arith.constant 0 : i32
    %c0_i32_1 = arith.constant 0 : i32
    return %c0_i32, %c0_i32_0 : i32, i32
  }
  func.func @transform_9(%arg0: i32) -> (i32, i32) {
    %c0_i32 = arith.constant 0 : i32
    %c0_i32_0 = arith.constant 0 : i32
    %c0_i32_1 = arith.constant 0 : i32
    return %c0_i32, %c0_i32_0 : i32, i32
  }
  func.func @transform_10(%arg0: i32) -> (i32, i32) {
    %c0_i32 = arith.constant 0 : i32
    %c0_i32_0 = arith.constant 0 : i32
    %c0_i32_1 = arith.constant 0 : i32
    return %c0_i32, %c0_i32_0 : i32, i32
  }
  func.func @transform_11(%arg0: i32) -> (i32, i32) {
    %c0_i32 = arith.constant 0 : i32
    %c0_i32_0 = arith.constant 0 : i32
    %c0_i32_1 = arith.constant 0 : i32
    return %c0_i32, %c0_i32_0 : i32, i32
  }
  func.func @transform_12(%arg0: i32) -> (i32, i32) {
    %c0_i32 = arith.constant 0 : i32
    %c0_i32_0 = arith.constant 0 : i32
    return %arg0, %c0_i32 : i32, i32
  }
}

</mosaic_0001>

<bundles_post_ra>
// kernel: _forward.1
= control target key start
LH: loop header
LB: loop body
LE: loop exit
PB: predicated region body
PF: predicated region fallthrough
CT: control target
= control target key end

     0   :  { %s2037_s21 = smov 0   ;;  %s2487_s0 = inlined_call_operand.vmem [shape: bf16[16,128], index: 0, kind: input, shape index: {}]   ;;  %s2488_s1 = inlined_call_operand.vmem [shape: f32[1,256], index: 1, kind: input, shape index: {}]   ;;  %s2489_s2 = inlined_call_operand.vmem [shape: bf16[128,256], index: 2, kind: input, shape index: {}]   ;;  %s2490_s3 = inlined_call_operand.vmem [shape: f32[1,256], index: 3, kind: input, shape index: {}]   ;;  %s2491_s4 = inlined_call_operand.vmem [shape: bf16[256,256], index: 4, kind: input, shape index: {}]   ;;  %s2492_s5 = inlined_call_operand.vmem [shape: f32[1,256], index: 5, kind: input, shape index: {}]   ;;  %s2493_s6 = inlined_call_operand.vmem [shape: bf16[256,256], index: 6, kind: input, shape index: {}]   ;;  %s2494_s7 = inlined_call_operand.vmem [shape: f32[1,256], index: 7, kind: input, shape index: {}]   ;;  %s2495_s8 = inlined_call_operand.vmem [shape: bf16[256,256], index: 8, kind: input, shape index: {}]   ;;  %s2496_s9 = inlined_call_operand.vmem [shape: f32[1,256], index: 9, kind: input, shape index: {}]   ;;  %s2497_s10 = inlined_call_operand.vmem [shape: bf16[256,128], index: 10, kind: input, shape index: {}]   ;;  %s2498_s11 = inlined_call_operand.vmem [shape: f32[1,128], index: 11, kind: input, shape index: {}]   ;;  %s2499_s12 = inlined_call_operand.vmem [shape: f32[32,128], index: 12, kind: output, shape index: {}]  }
   0x1 LB: > { %s2043_s22 = sadd.s32 4294967295, %s1969_s21   ;;  %p1603_p0 = scmp.ge.s32.totalorder %s1969_s21, 1  ;;  %s1969_s21 = sphi %s2037_s21, %s22_s21  }
   0x2   : > { %p352_p1 = scmp.lt.s32.totalorder %s1969_s21, 3 }
   0x4   : > { %p353_p2 = pnand %p1603_p0, %p352_p1 }
   0x5   : > { %s1604_s23 = sshll.u32 (!%p353_p2), %s2043_s22, 1  ;;  %p396_p3 = scmp.lt.s32.totalorder (!%p353_p2), %s2043_s22, 1  ;;  %v1770_v0 = vld [vmem:[%s2489_s2 + $0x4] ss:$8 sps:$4 sm:$0xff] (!%p353_p2)   ;;  %v1772_v1 = vld [vmem:[%s2489_s2] ss:$8 sps:$4 sm:$0xff] (!%p353_p2)  }
   0x6   : > { %356 = sbr.rel (%p353_p2) target bundleno = 1182 (0x49e), region = 68  ;;  %p390_p4 = scmp.lt.s32.totalorder (!%p353_p2), %s1604_s23, 3  ;;  %514 = vmatprep.subr.bf16.mxu0 (!%p353_p2), %v1770_v0  ;;  %v1773_v2 = vld [vmem:[%s2489_s2 + $0x14] ss:$8 sps:$4 sm:$0xff] (!%p353_p2)   ;;  %v1971_v3 = vmov (!%p353_p2), 0   ;;  %v1794_v27 = vld [vmem:[%s2487_s0] sm:$0xff] (!%p353_p2)  }
   0x7   : > { %546 = vmatprep.mubr.bf16.mxu0 (!%p353_p2), %v1971_v3  ;;  %515 = vmatpush1.bf16.msra.mxu0 (!%p353_p2), %v1772_v1  ;;  %v1775_v4 = vld [vmem:[%s2489_s2 + $0x10] ss:$8 sps:$4 sm:$0xff] (!%p353_p2)   ;;  %v1776_v5 = vld [vmem:[%s2489_s2 + $0x24] ss:$8 sps:$4 sm:$0xff] (!%p353_p2)   ;;  %v1778_v6 = vld [vmem:[%s2489_s2 + $0x20] ss:$8 sps:$4 sm:$0xff] (!%p353_p2)  }
   0x8   : > { %516 = vmatprep.subr.bf16.mxu0 (!%p353_p2), %v1773_v2  ;;  %v1779_v7 = vld [vmem:[%s2489_s2 + $0x34] ss:$8 sps:$4 sm:$0xff] (!%p353_p2)   ;;  %v1781_v8 = vld [vmem:[%s2489_s2 + $0x30] ss:$8 sps:$4 sm:$0xff] (!%p353_p2)   ;;  %v1782_v9 = vld [vmem:[%s2489_s2 + $0x44] ss:$8 sps:$4 sm:$0xff] (!%p353_p2)  }
   0x9   : > { %v1795_v10 = vld [vmem:[%s2491_s4 + $0x4] ss:$8 sps:$4 sm:$0xff] (!%p353_p2)   ;;  %v1797_v11 = vld [vmem:[%s2491_s4] ss:$8 sps:$4 sm:$0xff] (!%p353_p2)   ;;  %v1798_v12 = vld [vmem:[%s2491_s4 + $0x14] ss:$8 sps:$4 sm:$0xff] (!%p353_p2)  }
   0xa   : > { %787 = vmatprep.subr.bf16.mxu1 (!%p353_p2), %v1795_v10  ;;  %v1784_v13 = vld [vmem:[%s2489_s2 + $0x40] ss:$8 sps:$4 sm:$0xff] (!%p353_p2)   ;;  %v1800_v14 = vld [vmem:[%s2491_s4 + $0x10] ss:$8 sps:$4 sm:$0xff] (!%p353_p2)   ;;  %v1785_v15 = vld [vmem:[%s2489_s2 + $0x54] ss:$8 sps:$4 sm:$0xff] (!%p353_p2)  }
   0xb   : > { %517 = vmatpush1.bf16.msra.mxu0 (!%p353_p2), %v1775_v4  ;;  %788 = vmatpush1.bf16.msra.mxu1 (!%p353_p2), %v1797_v11  ;;  %v1801_v16 = vld [vmem:[%s2491_s4 + $0x24] ss:$8 sps:$4 sm:$0xff] (!%p353_p2)   ;;  %v1787_v17 = vld [vmem:[%s2489_s2 + $0x50] ss:$8 sps:$4 sm:$0xff] (!%p353_p2)   ;;  %v1803_v18 = vld [vmem:[%s2491_s4 + $0x20] ss:$8 sps:$4 sm:$0xff] (!%p353_p2)  }
   0xc   : > { %518 = vmatprep.subr.bf16.mxu0 (!%p353_p2), %v1776_v5  ;;  %789 = vmatprep.subr.bf16.mxu1 (!%p353_p2), %v1798_v12  ;;  %v1788_v19 = vld [vmem:[%s2489_s2 + $0x64] ss:$8 sps:$4 sm:$0xff] (!%p353_p2)   ;;  %v1804_v20 = vld [vmem:[%s2491_s4 + $0x34] ss:$8 sps:$4 sm:$0xff] (!%p353_p2)   ;;  %v1790_v21 = vld [vmem:[%s2489_s2 + $0x60] ss:$8 sps:$4 sm:$0xff] (!%p353_p2)  }
   0xd   : > { %s2501_s23 = smov (!%p390_p4, %s1604_s23), 3  ;;  %v1806_v22 = vld [vmem:[%s2491_s4 + $0x30] ss:$8 sps:$4 sm:$0xff]   ;;  %v1791_v23 = vld [vmem:[%s2489_s2 + $0x74] ss:$8 sps:$4 sm:$0xff]   ;;  %p397_p5 = scmp.ge.s32.totalorder %s2043_s22, 1 }
   0xe   : > { %s1605_s16 = sshll.u32 %s2501_s23, 3  ;;  %v1807_v24 = vld [vmem:[%s2491_s4 + $0x44] ss:$8 sps:$4 sm:$0xff]   ;;  %v1793_v25 = vld [vmem:[%s2489_s2 + $0x70] ss:$8 sps:$4 sm:$0xff]  }
   0xf   : > { %s2067_s19 = scalar_lea.vmem %s2499_s12, %s1605_s16  ;;  %519 = vmatpush1.bf16.msra.mxu0 %v1778_v6  ;;  %790 = vmatpush1.bf16.msra.mxu1 %v1800_v14  ;;  %v1809_v26 = vld [vmem:[%s2491_s4 + $0x40] ss:$8 sps:$4 sm:$0xff]   ;;  %v1810_v28 = vld [vmem:[%s2491_s4 + $0x54] ss:$8 sps:$4 sm:$0xff]   ;;  %v1812_v29 = vld [vmem:[%s2491_s4 + $0x50] ss:$8 sps:$4 sm:$0xff]   ;;  %v418_v14 = vlaneseq }
  0x10   : > { %520 = vmatprep.subr.bf16.mxu0 %v1779_v7  ;;  %791 = vmatprep.subr.bf16.mxu1 %v1801_v16  ;;  %v1813_v30 = vld [vmem:[%s2491_s4 + $0x64] ss:$8 sps:$4 sm:$0xff]   ;;  %v1815_v31 = vld [vmem:[%s2491_s4 + $0x60] ss:$8 sps:$4 sm:$0xff]   ;;  %v1816_v32 = vld [vmem:[%s2491_s4 + $0x74] ss:$8 sps:$4 sm:$0xff]  }
  0x11   : > { %v1818_v33 = vld [vmem:[%s2491_s4 + $0x70] ss:$8 sps:$4 sm:$0xff]   ;;  %v1819_v34 = vld [vmem:[%s2491_s4 + $0x84] ss:$8 sps:$4 sm:$0xff]   ;;  %v1821_v35 = vld [vmem:[%s2491_s4 + $0x80] ss:$8 sps:$4 sm:$0xff]  }
  0x12   : > { %v1822_v36 = vld [vmem:[%s2491_s4 + $0x94] ss:$8 sps:$4 sm:$0xff]   ;;  %v1824_v37 = vld [vmem:[%s2491_s4 + $0x90] ss:$8 sps:$4 sm:$0xff]   ;;  %v1825_v38 = vld [vmem:[%s2491_s4 + $0xa4] ss:$8 sps:$4 sm:$0xff]  }
  0x13   : > { %521 = vmatpush1.bf16.msra.mxu0 %v1781_v8  ;;  %792 = vmatpush1.bf16.msra.mxu1 %v1803_v18  ;;  %v1827_v39 = vld [vmem:[%s2491_s4 + $0xa0] ss:$8 sps:$4 sm:$0xff]   ;;  %v1828_v40 = vld [vmem:[%s2491_s4 + $0xb4] ss:$8 sps:$4 sm:$0xff]   ;;  %v1830_v41 = vld [vmem:[%s2491_s4 + $0xb0] ss:$8 sps:$4 sm:$0xff]  }
  0x14   : > { %522 = vmatprep.subr.bf16.mxu0 %v1782_v9  ;;  %793 = vmatprep.subr.bf16.mxu1 %v1804_v20  ;;  %v1831_v42 = vld [vmem:[%s2491_s4 + $0xc4] ss:$8 sps:$4 sm:$0xff]   ;;  %v1833_v43 = vld [vmem:[%s2491_s4 + $0xc0] ss:$8 sps:$4 sm:$0xff]   ;;  %v1834_v44 = vld [vmem:[%s2491_s4 + $0xd4] ss:$8 sps:$4 sm:$0xff]  }
  0x15   : > { %v1836_v45 = vld [vmem:[%s2491_s4 + $0xd0] ss:$8 sps:$4 sm:$0xff]   ;;  %v1837_v46 = vld [vmem:[%s2491_s4 + $0xe4] ss:$8 sps:$4 sm:$0xff]   ;;  %v1839_v47 = vld [vmem:[%s2491_s4 + $0xe0] ss:$8 sps:$4 sm:$0xff]  }
  0x16   : > { %v1840_v48 = vld [vmem:[%s2491_s4 + $0xf4] ss:$8 sps:$4 sm:$0xff]   ;;  %v1842_v49 = vld [vmem:[%s2491_s4 + $0xf0] ss:$8 sps:$4 sm:$0xff]   ;;  %v1843_v50 = vld [vmem:[%s2493_s6] ss:$8 sps:$4 sm:$0xff]  }
  0x17   : > { %523 = vmatpush1.bf16.msra.mxu0 %v1784_v13  ;;  %794 = vmatpush1.bf16.msra.mxu1 %v1806_v22  ;;  %v1845_v51 = vld [vmem:[%s2493_s6 + $0x4] ss:$8 sps:$4 sm:$0xff]   ;;  %v1848_v52 = vld [vmem:[%s2493_s6 + $0x14] ss:$8 sps:$4 sm:$0xff]   ;;  %v1846_v53 = vld [vmem:[%s2493_s6 + $0x10] ss:$8 sps:$4 sm:$0xff]  }
  0x18   : > { %524 = vmatprep.subr.bf16.mxu0 %v1785_v15  ;;  %795 = vmatprep.subr.bf16.mxu1 %v1807_v24  ;;  %v1851_v54 = vld [vmem:[%s2493_s6 + $0x24] ss:$8 sps:$4 sm:$0xff]   ;;  %v1849_v55 = vld [vmem:[%s2493_s6 + $0x20] ss:$8 sps:$4 sm:$0xff]   ;;  %v1854_v56 = vld [vmem:[%s2493_s6 + $0x34] ss:$8 sps:$4 sm:$0xff]  }
  0x19   : > { %v1852_v57 = vld [vmem:[%s2493_s6 + $0x30] ss:$8 sps:$4 sm:$0xff]   ;;  %v1857_v58 = vld [vmem:[%s2493_s6 + $0x44] ss:$8 sps:$4 sm:$0xff]   ;;  %v1855_v59 = vld [vmem:[%s2493_s6 + $0x40] ss:$8 sps:$4 sm:$0xff]  }
  0x1a   : > { %v1860_v60 = vld [vmem:[%s2493_s6 + $0x54] ss:$8 sps:$4 sm:$0xff]   ;;  %v1858_v61 = vld [vmem:[%s2493_s6 + $0x50] ss:$8 sps:$4 sm:$0xff]   ;;  %v1863_v62 = vld [vmem:[%s2493_s6 + $0x64] ss:$8 sps:$4 sm:$0xff]  }
  0x1b   : > { %525 = vmatpush1.bf16.msra.mxu0 %v1787_v17  ;;  %796 = vmatpush1.bf16.msra.mxu1 %v1809_v26  ;;  %v1861_v63 = vld [vmem:[%s2493_s6 + $0x60] ss:$8 sps:$4 sm:$0xff]   ;;  %v1866_v0 = vld [vmem:[%s2493_s6 + $0x74] ss:$8 sps:$4 sm:$0xff]   ;;  %v1864_v1 = vld [vmem:[%s2493_s6 + $0x70] ss:$8 sps:$4 sm:$0xff]  }
  0x1c   : > { %526 = vmatprep.subr.bf16.mxu0 %v1788_v19  ;;  %797 = vmatprep.subr.bf16.mxu1 %v1810_v28  ;;  %v1869_v2 = vld [vmem:[%s2493_s6 + $0x84] ss:$8 sps:$4 sm:$0xff]   ;;  %v1867_v3 = vld [vmem:[%s2493_s6 + $0x80] ss:$8 sps:$4 sm:$0xff]   ;;  %v1872_v4 = vld [vmem:[%s2493_s6 + $0x94] ss:$8 sps:$4 sm:$0xff]  }
  0x1d   : > { %v1870_v5 = vld [vmem:[%s2493_s6 + $0x90] ss:$8 sps:$4 sm:$0xff]   ;;  %v1875_v6 = vld [vmem:[%s2493_s6 + $0xa4] ss:$8 sps:$4 sm:$0xff]   ;;  %v1873_v7 = vld [vmem:[%s2493_s6 + $0xa0] ss:$8 sps:$4 sm:$0xff]  }
  0x1e   : > { %v1878_v8 = vld [vmem:[%s2493_s6 + $0xb4] ss:$8 sps:$4 sm:$0xff]   ;;  %v1876_v9 = vld [vmem:[%s2493_s6 + $0xb0] ss:$8 sps:$4 sm:$0xff]   ;;  %v1881_v10 = vld [vmem:[%s2493_s6 + $0xc4] ss:$8 sps:$4 sm:$0xff]  }
  0x1f   : > { %527 = vmatpush1.bf16.msra.mxu0 %v1790_v21  ;;  %798 = vmatpush1.bf16.msra.mxu1 %v1812_v29  ;;  %v1879_v11 = vld [vmem:[%s2493_s6 + $0xc0] ss:$8 sps:$4 sm:$0xff]   ;;  %v1884_v12 = vld [vmem:[%s2493_s6 + $0xd4] ss:$8 sps:$4 sm:$0xff]   ;;  %v1882_v13 = vld [vmem:[%s2493_s6 + $0xd0] ss:$8 sps:$4 sm:$0xff]  }
  0x20   : > { %528 = vmatprep.subr.bf16.mxu0 %v1791_v23  ;;  %799 = vmatprep.subr.bf16.mxu1 %v1813_v30  ;;  %s558_s13 = scalar_select %p397_p5, 1, 0  ;;  %v419_v15 = vshrl.u32 %v418_v14, 7  ;;  %v557_v16 = vld [vmem:[%s2488_s1] sm:$0x3] }
  0x21   : > { %v416_v19 = vld [vmem:[%s2490_s3] sm:$0x3] }
  0x22   : > { %s559_s14 = scvt.s32.f32 %s558_s13  ;;  %v2291_v18 = vsub.s32 0, %v419_v15  ;;  %v2296_v20 = vsub.s32 1, %v419_v15 }
  0x23   : > { %529 = vmatpush1.bf16.msra.mxu0 %v1793_v25  ;;  %800 = vmatpush1.bf16.msra.mxu1 %v1815_v31 }
  0x24   : > { %801 = vmatprep.subr.bf16.mxu1 %v1816_v32  ;;  %1040 = vmatprep.subr.bf16.mxu0 %v1845_v51  ;;  %v560_v17 = vstv %s559_s14  ;;  %v421_v22 = vrot.slane %v416_v19, %v2291_v18  ;;  %v425_v23 = vrot.slane %v416_v19, %v2296_v20  ;;  %v1894_v51 = vld [vmem:[%s2495_s8 + $0x10] ss:$8 sps:$4 sm:$0xff]  }
  0x25   : > { %v561_v21 = vmul.f32 %v560_v17, %v557_v16 }
  0x26   : > { %547 = vmatmul.mubr.bf16.vlgmr.msra.gmra.mrb[0].mxu0 %v1794_v27 }
  0x27   : > { %802 = vmatpush1.bf16.msra.mxu1 %v1818_v33  ;;  %1041 = vmatpush1.bf16.msra.mxu0 %v1843_v50  ;;  %v566_v24 = vrot.slane %v561_v21, %v2291_v18  ;;  %v570_v26 = vrot.slane %v561_v21, %v2296_v20  ;;  %v1896_v50 = vld [vmem:[%s2495_s8 + $0x14] ss:$8 sps:$4 sm:$0xff]  }
  0x28   : > { %803 = vmatprep.subr.bf16.mxu1 %v1819_v34  ;;  %1042 = vmatprep.subr.bf16.mxu0 %v1848_v52  ;;  %v1899_v52 = vld [vmem:[%s2495_s8 + $0x24] ss:$8 sps:$4 sm:$0xff]  }
  0x2b   : > { %804 = vmatpush1.bf16.msra.mxu1 %v1821_v35  ;;  %1043 = vmatpush1.bf16.msra.mxu0 %v1846_v53  ;;  %v1897_v53 = vld [vmem:[%s2495_s8 + $0x20] ss:$8 sps:$4 sm:$0xff]  }
  0x2c   : > { %805 = vmatprep.subr.bf16.mxu1 %v1822_v36  ;;  %1044 = vmatprep.subr.bf16.mxu0 %v1851_v54  ;;  %v1902_v54 = vld [vmem:[%s2495_s8 + $0x34] ss:$8 sps:$4 sm:$0xff]  }
  0x2f   : > { %806 = vmatpush1.bf16.msra.mxu1 %v1824_v37  ;;  %1045 = vmatpush1.bf16.msra.mxu0 %v1849_v55  ;;  %v1900_v55 = vld [vmem:[%s2495_s8 + $0x30] ss:$8 sps:$4 sm:$0xff]  }
  0x30   : > { %807 = vmatprep.subr.bf16.mxu1 %v1825_v38  ;;  %1046 = vmatprep.subr.bf16.mxu0 %v1854_v56  ;;  %v1905_v56 = vld [vmem:[%s2495_s8 + $0x44] ss:$8 sps:$4 sm:$0xff]  }
  0x33   : > { %808 = vmatpush1.bf16.msra.mxu1 %v1827_v39  ;;  %1047 = vmatpush1.bf16.msra.mxu0 %v1852_v57  ;;  %v1903_v57 = vld [vmem:[%s2495_s8 + $0x40] ss:$8 sps:$4 sm:$0xff]  }
  0x34   : > { %809 = vmatprep.subr.bf16.mxu1 %v1828_v40  ;;  %1048 = vmatprep.subr.bf16.mxu0 %v1857_v58  ;;  %v1908_v58 = vld [vmem:[%s2495_s8 + $0x54] ss:$8 sps:$4 sm:$0xff]  }
  0x37   : > { %810 = vmatpush1.bf16.msra.mxu1 %v1830_v41  ;;  %1049 = vmatpush1.bf16.msra.mxu0 %v1855_v59  ;;  %v1906_v59 = vld [vmem:[%s2495_s8 + $0x50] ss:$8 sps:$4 sm:$0xff]  }
  0x38   : > { %811 = vmatprep.subr.bf16.mxu1 %v1831_v42  ;;  %1050 = vmatprep.subr.bf16.mxu0 %v1860_v60  ;;  %v1911_v60 = vld [vmem:[%s2495_s8 + $0x64] ss:$8 sps:$4 sm:$0xff]  }
  0x3b   : > { %812 = vmatpush1.bf16.msra.mxu1 %v1833_v43  ;;  %1051 = vmatpush1.bf16.msra.mxu0 %v1858_v61  ;;  %v1909_v61 = vld [vmem:[%s2495_s8 + $0x60] ss:$8 sps:$4 sm:$0xff]  }
  0x3c   : > { %813 = vmatprep.subr.bf16.mxu1 %v1834_v44  ;;  %1052 = vmatprep.subr.bf16.mxu0 %v1863_v62  ;;  %v1887_v44 = vld [vmem:[%s2493_s6 + $0xe4] ss:$8 sps:$4 sm:$0xff]   ;;  %v1914_v62 = vld [vmem:[%s2495_s8 + $0x74] ss:$8 sps:$4 sm:$0xff]  }
  0x3f   : > { %814 = vmatpush1.bf16.msra.mxu1 %v1836_v45  ;;  %1053 = vmatpush1.bf16.msra.mxu0 %v1861_v63  ;;  %v1885_v45 = vld [vmem:[%s2493_s6 + $0xe0] ss:$8 sps:$4 sm:$0xff]   ;;  %v1912_v63 = vld [vmem:[%s2495_s8 + $0x70] ss:$8 sps:$4 sm:$0xff]  }
  0x40   : > { %815 = vmatprep.subr.bf16.mxu1 %v1837_v46  ;;  %1054 = vmatprep.subr.bf16.mxu0 %v1866_v0  ;;  %v1890_v46 = vld [vmem:[%s2493_s6 + $0xf4] ss:$8 sps:$4 sm:$0xff]   ;;  %v1917_v0 = vld [vmem:[%s2495_s8 + $0x84] ss:$8 sps:$4 sm:$0xff]  }
  0x43   : > { %816 = vmatpush1.bf16.msra.mxu1 %v1839_v47  ;;  %1055 = vmatpush1.bf16.msra.mxu0 %v1864_v1  ;;  %v1888_v47 = vld [vmem:[%s2493_s6 + $0xf0] ss:$8 sps:$4 sm:$0xff]   ;;  %v1915_v1 = vld [vmem:[%s2495_s8 + $0x80] ss:$8 sps:$4 sm:$0xff]  }
  0x44   : > { %817 = vmatprep.subr.bf16.mxu1 %v1840_v48  ;;  %1056 = vmatprep.subr.bf16.mxu0 %v1869_v2  ;;  %v1891_v48 = vld [vmem:[%s2495_s8] ss:$8 sps:$4 sm:$0xff]   ;;  %v1920_v2 = vld [vmem:[%s2495_s8 + $0x94] ss:$8 sps:$4 sm:$0xff]  }
  0x47   : > { %818 = vmatpush1.bf16.msra.mxu1 %v1842_v49  ;;  %1057 = vmatpush1.bf16.msra.mxu0 %v1867_v3  ;;  %v1893_v49 = vld [vmem:[%s2495_s8 + $0x4] ss:$8 sps:$4 sm:$0xff]   ;;  %v1918_v3 = vld [vmem:[%s2495_s8 + $0x90] ss:$8 sps:$4 sm:$0xff]  }
  0x48   : > { %1058 = vmatprep.subr.bf16.mxu0 %v1872_v4  ;;  %1293 = vmatprep.subr.bf16.mxu1 %v1893_v49  ;;  %v1923_v4 = vld [vmem:[%s2495_s8 + $0xa4] ss:$8 sps:$4 sm:$0xff]  }
  0x4b   : > { %1059 = vmatpush1.bf16.msra.mxu0 %v1870_v5  ;;  %v1921_v5 = vld [vmem:[%s2495_s8 + $0xa0] ss:$8 sps:$4 sm:$0xff]  }
  0x4c   : > { %1060 = vmatprep.subr.bf16.mxu0 %v1875_v6  ;;  %v1926_v6 = vld [vmem:[%s2495_s8 + $0xb4] ss:$8 sps:$4 sm:$0xff]  }
  0x4f   : > { %1061 = vmatpush1.bf16.msra.mxu0 %v1873_v7  ;;  %v1924_v7 = vld [vmem:[%s2495_s8 + $0xb0] ss:$8 sps:$4 sm:$0xff]  }
  0x50   : > { %1062 = vmatprep.subr.bf16.mxu0 %v1878_v8  ;;  %v1929_v8 = vld [vmem:[%s2495_s8 + $0xc4] ss:$8 sps:$4 sm:$0xff]  }
  0x53   : > { %1063 = vmatpush1.bf16.msra.mxu0 %v1876_v9  ;;  %v1927_v9 = vld [vmem:[%s2495_s8 + $0xc0] ss:$8 sps:$4 sm:$0xff]  }
  0x54   : > { %1064 = vmatprep.subr.bf16.mxu0 %v1881_v10  ;;  %v1932_v10 = vld [vmem:[%s2495_s8 + $0xd4] ss:$8 sps:$4 sm:$0xff]  }
  0x57   : > { %1065 = vmatpush1.bf16.msra.mxu0 %v1879_v11  ;;  %v1930_v11 = vld [vmem:[%s2495_s8 + $0xd0] ss:$8 sps:$4 sm:$0xff]  }
  0x58   : > { %1066 = vmatprep.subr.bf16.mxu0 %v1884_v12  ;;  %v615_v12 = vld [vmem:[%s2492_s5] sm:$0x3] }
  0x59   : > { %v624_v14 = vrot.slane %v615_v12, %v2296_v20 }
  0x5b   : > { %1067 = vmatpush1.bf16.msra.mxu0 %v1882_v13  ;;  %v620_v13 = vrot.slane %v615_v12, %v2291_v18 }
  0x5c   : > { %1068 = vmatprep.subr.bf16.mxu0 %v1887_v44  ;;  %v1948_v44 = vld [vmem:[%s2497_s10 + $0x20] sm:$0xff]  }
  0x5f   : > { %1069 = vmatpush1.bf16.msra.mxu0 %v1885_v45  ;;  %v1949_v45 = vld [vmem:[%s2497_s10 + $0x68] sm:$0xff]  }
  0x60   : > { %1070 = vmatprep.subr.bf16.mxu0 %v1890_v46  ;;  %v868_v46 = vld [vmem:[%s2494_s7] sm:$0x3] }
  0x63   : > { %1071 = vmatpush1.bf16.msra.mxu0 %v1888_v47  ;;  %v873_v47 = vrot.slane %v868_v46, %v2291_v18 }
  0xf9   : > { %v548_v25 = vpop.f32.mrb[0].mxu0 }
  0xfa   : > { %v549_v27 = vadd.f32 %v548_v25, %v421_v22  ;;  %v550_v28 = vpop.f32.mrb[1].mxu0 }
  0xfb   : > { %v551_v29 = vadd.f32 %v550_v28, %v425_v23  ;;  %v552_v30 = vpop.f32.mrb[2].mxu0 }
  0xfc   : > { %v573_v31 = vadd.f32 %v566_v24, %v549_v27  ;;  %v553_v32 = vadd.f32 %v552_v30, %v421_v22  ;;  %v554_v33 = vpop.f32.mrb[3].mxu0 }
  0xfd   : > { %v555_v34 = vadd.f32 %v554_v33, %v425_v23  ;;  %v574_v35 = vadd.f32 %v570_v26, %v551_v29  ;;  %v1938_v33 = vld [vmem:[%s2495_s8 + $0xf4] ss:$8 sps:$4 sm:$0xff]  }
  0xfe   : > { %v575_v36 = vadd.f32 %v566_v24, %v553_v32  ;;  %v577_v38 = vmax.f32 %v573_v31, 0.0  ;;  %v1935_v31 = vld [vmem:[%s2495_s8 + $0xe4] ss:$8 sps:$4 sm:$0xff]   ;;  %v1933_v32 = vld [vmem:[%s2495_s8 + $0xe0] ss:$8 sps:$4 sm:$0xff]  }
  0xff   : > { %v576_v37 = vadd.f32 %v570_v26, %v555_v34  ;;  %v578_v40 = vmax.f32 %v574_v35, 0.0  ;;  %v1936_v34 = vld [vmem:[%s2495_s8 + $0xf0] ss:$8 sps:$4 sm:$0xff]   ;;  %v1939_v35 = vld [vmem:[%s2497_s10 + $0x40] sm:$0xff]  }
 0x100   : > { %v579_v39 = vmax.f32 %v575_v36, 0.0  ;;  %v1940_v36 = vld [vmem:[%s2497_s10] sm:$0xff]   ;;  %1739 = vmatprep.subr.bf16.mxu0 %v1939_v35 }
 0x101   : > { %v580_v41 = vmax.f32 %v576_v37, 0.0  ;;  %v1941_v37 = vld [vmem:[%s2497_s10 + $0x48] sm:$0xff]  }
 0x102   : > { %v581_v42 = vpack.c.bf16 %v579_v39, %v577_v38  ;;  %v1942_v38 = vld [vmem:[%s2497_s10 + $0x8] sm:$0xff]   ;;  %v1943_v39 = vld [vmem:[%s2497_s10 + $0x50] sm:$0xff]  }
 0x103   : > { %v582_v43 = vpack.c.bf16 %v580_v41, %v578_v40  ;;  %v1944_v40 = vld [vmem:[%s2497_s10 + $0x10] sm:$0xff]   ;;  %v1945_v41 = vld [vmem:[%s2497_s10 + $0x58] sm:$0xff]  }
 0x105   : > { %819 = vmatprep.mubr.bf16.mxu1 %v582_v43  ;;  %v1947_v43 = vld [vmem:[%s2497_s10 + $0x60] sm:$0xff]  }
 0x106   : > { %820 = vmatmul.mubr.bf16.vlgmr.msra.gmra.mrb[0].mxu1 %v581_v42  ;;  %v1946_v42 = vld [vmem:[%s2497_s10 + $0x18] sm:$0xff]  }
 0x107   : > { %1294 = vmatpush1.bf16.msra.mxu1 %v1891_v48  ;;  %v877_v48 = vrot.slane %v868_v46, %v2296_v20 }
 0x108   : > { %1295 = vmatprep.subr.bf16.mxu1 %v1896_v50 }
 0x10b   : > { %1296 = vmatpush1.bf16.msra.mxu1 %v1894_v51 }
 0x10c   : > { %1297 = vmatprep.subr.bf16.mxu1 %v1899_v52 }
 0x10f   : > { %1298 = vmatpush1.bf16.msra.mxu1 %v1897_v53 }
 0x110   : > { %1299 = vmatprep.subr.bf16.mxu1 %v1902_v54 }
 0x113   : > { %1300 = vmatpush1.bf16.msra.mxu1 %v1900_v55 }
 0x114   : > { %1301 = vmatprep.subr.bf16.mxu1 %v1905_v56 }
 0x117   : > { %1302 = vmatpush1.bf16.msra.mxu1 %v1903_v57 }
 0x118   : > { %1303 = vmatprep.subr.bf16.mxu1 %v1908_v58 }
 0x11b   : > { %1304 = vmatpush1.bf16.msra.mxu1 %v1906_v59 }
 0x11c   : > { %1305 = vmatprep.subr.bf16.mxu1 %v1911_v60 }
 0x11f   : > { %1306 = vmatpush1.bf16.msra.mxu1 %v1909_v61 }
 0x120   : > { %1307 = vmatprep.subr.bf16.mxu1 %v1914_v62 }
 0x123   : > { %1308 = vmatpush1.bf16.msra.mxu1 %v1912_v63  ;;  %v1950_v63 = vld [vmem:[%s2497_s10 + $0x28] sm:$0xff]  }
 0x124   : > { %1309 = vmatprep.subr.bf16.mxu1 %v1917_v0  ;;  %v1951_v0 = vld [vmem:[%s2497_s10 + $0x70] sm:$0xff]  }
 0x127   : > { %1310 = vmatpush1.bf16.msra.mxu1 %v1915_v1  ;;  %v1952_v1 = vld [vmem:[%s2497_s10 + $0x30] sm:$0xff]  }
 0x128   : > { %1311 = vmatprep.subr.bf16.mxu1 %v1920_v2  ;;  %v1953_v2 = vld [vmem:[%s2497_s10 + $0x78] sm:$0xff]  }
 0x12b   : > { %1312 = vmatpush1.bf16.msra.mxu1 %v1918_v3  ;;  %v1954_v3 = vld [vmem:[%s2497_s10 + $0x38] sm:$0xff]  }
 0x12c   : > { %1313 = vmatprep.subr.bf16.mxu1 %v1923_v4  ;;  %v1121_v4 = vld [vmem:[%s2496_s9] sm:$0x3] }
 0x12f   : > { %1314 = vmatpush1.bf16.msra.mxu1 %v1921_v5  ;;  %v1126_v5 = vrot.slane %v1121_v4, %v2291_v18  ;;  %v1719_v18 = vld [vmem:[%s2498_s11] ss:$0 sm:$0xff] }
 0x130   : > { %1315 = vmatprep.subr.bf16.mxu1 %v1926_v6  ;;  %v1130_v6 = vrot.slane %v1121_v4, %v2296_v20 }
 0x133   : > { %1316 = vmatpush1.bf16.msra.mxu1 %v1924_v7 }
 0x134   : > { %1317 = vmatprep.subr.bf16.mxu1 %v1929_v8 }
 0x137   : > { %1318 = vmatpush1.bf16.msra.mxu1 %v1927_v9 }
 0x138   : > { %1319 = vmatprep.subr.bf16.mxu1 %v1932_v10 }
 0x13b   : > { %1320 = vmatpush1.bf16.msra.mxu1 %v1930_v11 }
 0x13c   : > { %1321 = vmatprep.subr.bf16.mxu1 %v1935_v31 }
 0x13f   : > { %1322 = vmatpush1.bf16.msra.mxu1 %v1933_v32 }
 0x140   : > { %1323 = vmatprep.subr.bf16.mxu1 %v1938_v33 }
 0x143   : > { %1324 = vmatpush1.bf16.msra.mxu1 %v1936_v34 }
 0x1d9   : > { %v821_v15 = vpop.f32.mrb[0].mxu1 }
 0x1da   : > { %v822_v16 = vadd.f32 %v821_v15, %v620_v13  ;;  %v823_v17 = vpop.f32.mrb[1].mxu1 }
 0x1db   : > { %v824_v19 = vadd.f32 %v823_v17, %v624_v14  ;;  %v825_v21 = vpop.f32.mrb[2].mxu1 }
 0x1dc   : > { %v826_v22 = vadd.f32 %v825_v21, %v620_v13  ;;  %v827_v23 = vpop.f32.mrb[3].mxu1  ;;  %v830_v25 = vmax.f32 %v822_v16, 0.0 }
 0x1dd   : > { %v828_v24 = vadd.f32 %v827_v23, %v624_v14  ;;  %v831_v27 = vmax.f32 %v824_v19, 0.0 }
 0x1de   : > { %v832_v26 = vmax.f32 %v826_v22, 0.0 }
 0x1df   : > { %v833_v28 = vmax.f32 %v828_v24, 0.0 }
 0x1e0   : > { %v834_v29 = vpack.c.bf16 %v832_v26, %v830_v25 }
 0x1e1   : > { %v835_v30 = vpack.c.bf16 %v833_v28, %v831_v27 }
 0x1e3   : > { %1072 = vmatprep.mubr.bf16.mxu0 %v835_v30 }
 0x1e4   : > { %1073 = vmatmul.mubr.bf16.vlgmr.msra.gmra.mrb[4].mxu0 %v834_v29 }
 0x1e5   : > { %1740 = vmatpush3.bf16.msra.mxu0 %v1940_v36 }
 0x1e6   : > { %1741 = vmatprep.subr.bf16.mxu0 %v1941_v37 }
 0x1e9   : > { %1742 = vmatpush3.bf16.msra.mxu0 %v1942_v38 }
 0x1ea   : > { %1743 = vmatprep.subr.bf16.mxu0 %v1943_v39 }
 0x1ed   : > { %1744 = vmatpush3.bf16.msra.mxu0 %v1944_v40 }
 0x1ee   : > { %1745 = vmatprep.subr.bf16.mxu0 %v1945_v41 }
 0x1f1   : > { %1746 = vmatpush3.bf16.msra.mxu0 %v1946_v42 }
 0x1f2   : > { %1747 = vmatprep.subr.bf16.mxu0 %v1947_v43 }
 0x1f5   : > { %1748 = vmatpush3.bf16.msra.mxu0 %v1948_v44 }
 0x1f6   : > { %1749 = vmatprep.subr.bf16.mxu0 %v1949_v45 }
 0x1f9   : > { %1750 = vmatpush3.bf16.msra.mxu0 %v1950_v63 }
 0x1fa   : > { %1751 = vmatprep.subr.bf16.mxu0 %v1951_v0 }
 0x1fd   : > { %1752 = vmatpush3.bf16.msra.mxu0 %v1952_v1 }
 0x1fe   : > { %1753 = vmatprep.subr.bf16.mxu0 %v1953_v2 }
 0x201   : > { %1754 = vmatpush3.bf16.msra.mxu0 %v1954_v3 }
 0x2b7   : > { %v1074_v49 = vpop.f32.mrb[4].mxu0 }
 0x2b8   : > { %v1075_v50 = vadd.f32 %v1074_v49, %v873_v47  ;;  %v1076_v51 = vpop.f32.mrb[5].mxu0 }
 0x2b9   : > { %v1077_v52 = vadd.f32 %v1076_v51, %v877_v48  ;;  %v1078_v53 = vpop.f32.mrb[6].mxu0 }
 0x2ba   : > { %v1079_v54 = vadd.f32 %v1078_v53, %v873_v47  ;;  %v1080_v55 = vpop.f32.mrb[7].mxu0  ;;  %v1083_v57 = vmax.f32 %v1075_v50, 0.0 }
 0x2bb   : > { %v1081_v56 = vadd.f32 %v1080_v55, %v877_v48  ;;  %v1084_v59 = vmax.f32 %v1077_v52, 0.0 }
 0x2bc   : > { %v1085_v58 = vmax.f32 %v1079_v54, 0.0 }
 0x2bd   : > { %v1086_v60 = vmax.f32 %v1081_v56, 0.0 }
 0x2be   : > { %v1087_v61 = vpack.c.bf16 %v1085_v58, %v1083_v57 }
 0x2bf   : > { %v1088_v62 = vpack.c.bf16 %v1086_v60, %v1084_v59 }
 0x2c1   : > { %1325 = vmatprep.mubr.bf16.mxu1 %v1088_v62 }
 0x2c2   : > { %1326 = vmatmul.mubr.bf16.vlgmr.msra.gmra.mrb[4].mxu1 %v1087_v61 }
 0x395   : > { %v1327_v7 = vpop.f32.mrb[4].mxu1 }
 0x396   : > { %v1328_v8 = vadd.f32 %v1327_v7, %v1126_v5  ;;  %v1329_v9 = vpop.f32.mrb[5].mxu1 }
 0x397   : > { %v1330_v10 = vadd.f32 %v1329_v9, %v1130_v6  ;;  %v1331_v11 = vpop.f32.mrb[6].mxu1 }
 0x398   : > { %v1332_v12 = vadd.f32 %v1331_v11, %v1126_v5  ;;  %v1333_v13 = vpop.f32.mrb[7].mxu1  ;;  %v1336_v15 = vmax.f32 %v1328_v8, 0.0 }
 0x399   : > { %v1334_v14 = vadd.f32 %v1333_v13, %v1130_v6  ;;  %v1337_v17 = vmax.f32 %v1330_v10, 0.0 }
 0x39a   : > { %v1338_v16 = vmax.f32 %v1332_v12, 0.0 }
 0x39b   : > { %v1339_v19 = vmax.f32 %v1334_v14, 0.0 }
 0x39c   : > { %v1340_v21 = vpack.c.bf16 %v1338_v16, %v1336_v15 }
 0x39d   : > { %v1341_v22 = vpack.c.bf16 %v1339_v19, %v1337_v17 }
 0x39f   : > { %1509 = vmatprep.mubr.bf16.mxu0 %v1341_v22 }
 0x3a0   : > { %1510 = vmatmul.mubr.bf16.vlgmr.msra.gmra.mrb[8].mxu0 %v1340_v21 }
 0x473   : > { %v1755_v23 = vpop.f32.mrb[8].mxu0  ;;  %1520 = sbr.rel (%p397_p5) target bundleno = 1148 (0x47c), region = 72 }
 0x474   : > { %v1756_v20 = vpop.f32.mrb[9].mxu0 }
 0x475   : > { %v1757_v24 = vadd.f32 %v1756_v20, %v1755_v23  ;;  %v1758_v25 = vpop.f32.mrb[10].mxu0 }
 0x476   : > { %v1759_v26 = vpop.f32.mrb[11].mxu0 }
 0x477   : > { %v1512_v27 = vadd.f32 %v1757_v24, %v1719_v18  ;;  %v1760_v28 = vadd.f32 %v1759_v26, %v1758_v25 }
 0x479   : > { %v1515_v29 = vadd.f32 %v1760_v28, %v1719_v18  ;;  %1521 = vst [vmem:[%s2067_s19] sm:$0xff] (!%p397_p5), %v1512_v27 }
 0x47b   : > { %1522 = vst [vmem:[%s2067_s19 + $0x8] sm:$0xff] %v1515_v29 }
 0x47c PF: > { %1525 = sbr.rel (%p396_p3) target bundleno = 1182 (0x49e), region = 76  ;;  %v1528_v30 = vmin.f32 (!%p396_p3), %v1512_v27, 20.0  ;;  %v1529_v31 = vmin.f32 (!%p396_p3), %v1515_v29, 20.0  ;;  %vm1526_vm1 = vcmp.gt.f32.partialorder (!%p396_p3), %v1512_v27, 20.0  ;;  %vm1527_vm3 = vcmp.gt.f32.partialorder (!%p396_p3), %v1515_v29, 20.0 }
 0x47e   : > { %v1530_v32 = vmul.f32 (!%p396_p3), 1.442695, %v1528_v30  ;;  %v1532_v33 = vmul.f32 (!%p396_p3), 1.442695, %v1529_v31 }
 0x480   : > { %1955 = vpow2.f32 (!%p396_p3), %v1530_v32 }
 0x481   : > { %1957 = vpow2.f32 (!%p396_p3), %v1532_v33 }
 0x48a   : > { %v1956_v34 = vpop.eup %1955 }
 0x48b   : > { %v1958_v35 = vpop.eup %1957  ;;  %v1534_v36 = vadd.f32 1.0, %v1956_v34  ;;  %v1537_v38 = vmul.f32 -0.5, %v1956_v34  ;;  %v1540_v41 = vand.u32 2147483647, %v1956_v34 }
 0x48c   : > { %v1543_v37 = vadd.f32 1.0, %v1958_v35  ;;  %v1546_v39 = vmul.f32 -0.5, %v1958_v35  ;;  %v1549_v43 = vand.u32 2147483647, %v1958_v35 }
 0x48d   : > { %1959 = vlog2.f32 %v1534_v36  ;;  %v1538_v40 = vadd.f32 1.0, %v1537_v38  ;;  %vm1541_vm0 = vcmp.lt.f32.partialorder %v1540_v41, 0.0004427343 }
 0x48e   : > { %1961 = vlog2.f32 %v1543_v37  ;;  %v1547_v42 = vadd.f32 1.0, %v1546_v39  ;;  %vm1550_vm2 = vcmp.lt.f32.partialorder %v1549_v43, 0.0004427343 }
 0x48f   : > { %v1539_v44 = vmul.f32 %v1956_v34, %v1538_v40 }
 0x490   : > { %v1548_v46 = vmul.f32 %v1958_v35, %v1547_v42 }
 0x497   : > { %v1960_v45 = vpop.eup %1959 }
 0x498   : > { %v1962_v47 = vpop.eup %1961  ;;  %v1536_v48 = vmul.f32 0.6931472, %v1960_v45 }
 0x499   : > { %v1545_v49 = vmul.f32 0.6931472, %v1962_v47 }
 0x49a   : > { %v1542_v50 = vsel %vm1541_vm0, %v1539_v44, %v1536_v48 }
 0x49b   : > { %v1552_v51 = vsel %vm1526_vm1, %v1512_v27, %v1542_v50  ;;  %v1551_v52 = vsel %vm1550_vm2, %v1548_v46, %v1545_v49 }
 0x49c   : > { %1554 = vst [vmem:[%s2067_s19] sm:$0xff] %v1552_v51  ;;  %v1553_v53 = vsel %vm1527_vm3, %v1515_v29, %v1551_v52 }
 0x49d   : > { %1555 = vst [vmem:[%s2067_s19 + $0x8] sm:$0xff] %v1553_v53 }
 0x49e PF: > { %s22_s21 = sadd.s32 1, %s1969_s21  }
 0x49f   : > { %p19_p6 = scmp.ge.s32.totalorder %s22_s21, 4  }
 0x4a1   :  { %21 = sbr.rel (!%p19_p6) target bundleno = 1 (0x1), region = 103 }

// kernel: _forward.1
= control target key start
LH: loop header
LB: loop body
LE: loop exit
PB: predicated region body
PF: predicated region fallthrough
CT: control target
= control target key end

     0   :  { %s2037_s21 = smov 0   ;;  %s2487_s0 = inlined_call_operand.vmem [shape: bf16[16,128], index: 0, kind: input, shape index: {}]   ;;  %s2488_s1 = inlined_call_operand.vmem [shape: f32[1,256], index: 1, kind: input, shape index: {}]   ;;  %s2489_s2 = inlined_call_operand.vmem [shape: bf16[128,256], index: 2, kind: input, shape index: {}]   ;;  %s2490_s3 = inlined_call_operand.vmem [shape: f32[1,256], index: 3, kind: input, shape index: {}]   ;;  %s2491_s4 = inlined_call_operand.vmem [shape: bf16[256,256], index: 4, kind: input, shape index: {}]   ;;  %s2492_s5 = inlined_call_operand.vmem [shape: f32[1,256], index: 5, kind: input, shape index: {}]   ;;  %s2493_s6 = inlined_call_operand.vmem [shape: bf16[256,256], index: 6, kind: input, shape index: {}]   ;;  %s2494_s7 = inlined_call_operand.vmem [shape: f32[1,256], index: 7, kind: input, shape index: {}]   ;;  %s2495_s8 = inlined_call_operand.vmem [shape: bf16[256,256], index: 8, kind: input, shape index: {}]   ;;  %s2496_s9 = inlined_call_operand.vmem [shape: f32[1,256], index: 9, kind: input, shape index: {}]   ;;  %s2497_s10 = inlined_call_operand.vmem [shape: bf16[256,128], index: 10, kind: input, shape index: {}]   ;;  %s2498_s11 = inlined_call_operand.vmem [shape: f32[1,128], index: 11, kind: input, shape index: {}]   ;;  %s2499_s12 = inlined_call_operand.vmem [shape: f32[32,128], index: 12, kind: output, shape index: {}]  }
   0x1 LB: > { %s2043_s22 = sadd.s32 4294967295, %s1969_s21   ;;  %p1603_p0 = scmp.ge.s32.totalorder %s1969_s21, 1  ;;  %s1969_s21 = sphi %s2037_s21, %s22_s21  }
   0x2   : > { %p352_p1 = scmp.lt.s32.totalorder %s1969_s21, 3 }
   0x4   : > { %p353_p2 = pnand %p1603_p0, %p352_p1 }
   0x5   : > { %s1604_s23 = sshll.u32 (!%p353_p2), %s2043_s22, 1  ;;  %p396_p3 = scmp.lt.s32.totalorder (!%p353_p2), %s2043_s22, 1  ;;  %v1770_v0 = vld [vmem:[%s2489_s2 + $0x4] ss:$8 sps:$4 sm:$0xff] (!%p353_p2)   ;;  %v1772_v1 = vld [vmem:[%s2489_s2] ss:$8 sps:$4 sm:$0xff] (!%p353_p2)  }
   0x6   : > { %356 = sbr.rel (%p353_p2) target bundleno = 1182 (0x49e), region = 68  ;;  %p390_p4 = scmp.lt.s32.totalorder (!%p353_p2), %s1604_s23, 3  ;;  %514 = vmatprep.subr.bf16.mxu0 (!%p353_p2), %v1770_v0  ;;  %v1773_v2 = vld [vmem:[%s2489_s2 + $0x14] ss:$8 sps:$4 sm:$0xff] (!%p353_p2)   ;;  %v1971_v3 = vmov (!%p353_p2), 0   ;;  %v1794_v27 = vld [vmem:[%s2487_s0] sm:$0xff] (!%p353_p2)  }
   0x7   : > { %546 = vmatprep.mubr.bf16.mxu0 (!%p353_p2), %v1971_v3  ;;  %515 = vmatpush1.bf16.msra.mxu0 (!%p353_p2), %v1772_v1  ;;  %v1775_v4 = vld [vmem:[%s2489_s2 + $0x10] ss:$8 sps:$4 sm:$0xff] (!%p353_p2)   ;;  %v1776_v5 = vld [vmem:[%s2489_s2 + $0x24] ss:$8 sps:$4 sm:$0xff] (!%p353_p2)   ;;  %v1778_v6 = vld [vmem:[%s2489_s2 + $0x20] ss:$8 sps:$4 sm:$0xff] (!%p353_p2)  }
   0x8   : > { %516 = vmatprep.subr.bf16.mxu0 (!%p353_p2), %v1773_v2  ;;  %v1779_v7 = vld [vmem:[%s2489_s2 + $0x34] ss:$8 sps:$4 sm:$0xff] (!%p353_p2)   ;;  %v1781_v8 = vld [vmem:[%s2489_s2 + $0x30] ss:$8 sps:$4 sm:$0xff] (!%p353_p2)   ;;  %v1782_v9 = vld [vmem:[%s2489_s2 + $0x44] ss:$8 sps:$4 sm:$0xff] (!%p353_p2)  }
   0x9   : > { %v1795_v10 = vld [vmem:[%s2491_s4 + $0x4] ss:$8 sps:$4 sm:$0xff] (!%p353_p2)   ;;  %v1797_v11 = vld [vmem:[%s2491_s4] ss:$8 sps:$4 sm:$0xff] (!%p353_p2)   ;;  %v1798_v12 = vld [vmem:[%s2491_s4 + $0x14] ss:$8 sps:$4 sm:$0xff] (!%p353_p2)  }
   0xa   : > { %787 = vmatprep.subr.bf16.mxu1 (!%p353_p2), %v1795_v10  ;;  %v1784_v13 = vld [vmem:[%s2489_s2 + $0x40] ss:$8 sps:$4 sm:$0xff] (!%p353_p2)   ;;  %v1800_v14 = vld [vmem:[%s2491_s4 + $0x10] ss:$8 sps:$4 sm:$0xff] (!%p353_p2)   ;;  %v1785_v15 = vld [vmem:[%s2489_s2 + $0x54] ss:$8 sps:$4 sm:$0xff] (!%p353_p2)  }
   0xb   : > { %517 = vmatpush1.bf16.msra.mxu0 (!%p353_p2), %v1775_v4  ;;  %788 = vmatpush1.bf16.msra.mxu1 (!%p353_p2), %v1797_v11  ;;  %v1801_v16 = vld [vmem:[%s2491_s4 + $0x24] ss:$8 sps:$4 sm:$0xff] (!%p353_p2)   ;;  %v1787_v17 = vld [vmem:[%s2489_s2 + $0x50] ss:$8 sps:$4 sm:$0xff] (!%p353_p2)   ;;  %v1803_v18 = vld [vmem:[%s2491_s4 + $0x20] ss:$8 sps:$4 sm:$0xff] (!%p353_p2)  }
   0xc   : > { %518 = vmatprep.subr.bf16.mxu0 (!%p353_p2), %v1776_v5  ;;  %789 = vmatprep.subr.bf16.mxu1 (!%p353_p2), %v1798_v12  ;;  %v1788_v19 = vld [vmem:[%s2489_s2 + $0x64] ss:$8 sps:$4 sm:$0xff] (!%p353_p2)   ;;  %v1804_v20 = vld [vmem:[%s2491_s4 + $0x34] ss:$8 sps:$4 sm:$0xff] (!%p353_p2)   ;;  %v1790_v21 = vld [vmem:[%s2489_s2 + $0x60] ss:$8 sps:$4 sm:$0xff] (!%p353_p2)  }
   0xd   : > { %s2501_s23 = smov (!%p390_p4, %s1604_s23), 3  ;;  %v1806_v22 = vld [vmem:[%s2491_s4 + $0x30] ss:$8 sps:$4 sm:$0xff]   ;;  %v1791_v23 = vld [vmem:[%s2489_s2 + $0x74] ss:$8 sps:$4 sm:$0xff]   ;;  %p397_p5 = scmp.ge.s32.totalorder %s2043_s22, 1 }
   0xe   : > { %s1605_s16 = sshll.u32 %s2501_s23, 3  ;;  %v1807_v24 = vld [vmem:[%s2491_s4 + $0x44] ss:$8 sps:$4 sm:$0xff]   ;;  %v1793_v25 = vld [vmem:[%s2489_s2 + $0x70] ss:$8 sps:$4 sm:$0xff]  }
   0xf   : > { %s2067_s19 = scalar_lea.vmem %s2499_s12, %s1605_s16  ;;  %519 = vmatpush1.bf16.msra.mxu0 %v1778_v6  ;;  %790 = vmatpush1.bf16.msra.mxu1 %v1800_v14  ;;  %v1809_v26 = vld [vmem:[%s2491_s4 + $0x40] ss:$8 sps:$4 sm:$0xff]   ;;  %v1810_v28 = vld [vmem:[%s2491_s4 + $0x54] ss:$8 sps:$4 sm:$0xff]   ;;  %v1812_v29 = vld [vmem:[%s2491_s4 + $0x50] ss:$8 sps:$4 sm:$0xff]   ;;  %v418_v14 = vlaneseq }
  0x10   : > { %520 = vmatprep.subr.bf16.mxu0 %v1779_v7  ;;  %791 = vmatprep.subr.bf16.mxu1 %v1801_v16  ;;  %v1813_v30 = vld [vmem:[%s2491_s4 + $0x64] ss:$8 sps:$4 sm:$0xff]   ;;  %v1815_v31 = vld [vmem:[%s2491_s4 + $0x60] ss:$8 sps:$4 sm:$0xff]   ;;  %v1816_v32 = vld [vmem:[%s2491_s4 + $0x74] ss:$8 sps:$4 sm:$0xff]  }
  0x11   : > { %v1818_v33 = vld [vmem:[%s2491_s4 + $0x70] ss:$8 sps:$4 sm:$0xff]   ;;  %v1819_v34 = vld [vmem:[%s2491_s4 + $0x84] ss:$8 sps:$4 sm:$0xff]   ;;  %v1821_v35 = vld [vmem:[%s2491_s4 + $0x80] ss:$8 sps:$4 sm:$0xff]  }
  0x12   : > { %v1822_v36 = vld [vmem:[%s2491_s4 + $0x94] ss:$8 sps:$4 sm:$0xff]   ;;  %v1824_v37 = vld [vmem:[%s2491_s4 + $0x90] ss:$8 sps:$4 sm:$0xff]   ;;  %v1825_v38 = vld [vmem:[%s2491_s4 + $0xa4] ss:$8 sps:$4 sm:$0xff]  }
  0x13   : > { %521 = vmatpush1.bf16.msra.mxu0 %v1781_v8  ;;  %792 = vmatpush1.bf16.msra.mxu1 %v1803_v18  ;;  %v1827_v39 = vld [vmem:[%s2491_s4 + $0xa0] ss:$8 sps:$4 sm:$0xff]   ;;  %v1828_v40 = vld [vmem:[%s2491_s4 + $0xb4] ss:$8 sps:$4 sm:$0xff]   ;;  %v1830_v41 = vld [vmem:[%s2491_s4 + $0xb0] ss:$8 sps:$4 sm:$0xff]  }
  0x14   : > { %522 = vmatprep.subr.bf16.mxu0 %v1782_v9  ;;  %793 = vmatprep.subr.bf16.mxu1 %v1804_v20  ;;  %v1831_v42 = vld [vmem:[%s2491_s4 + $0xc4] ss:$8 sps:$4 sm:$0xff]   ;;  %v1833_v43 = vld [vmem:[%s2491_s4 + $0xc0] ss:$8 sps:$4 sm:$0xff]   ;;  %v1834_v44 = vld [vmem:[%s2491_s4 + $0xd4] ss:$8 sps:$4 sm:$0xff]  }
  0x15   : > { %v1836_v45 = vld [vmem:[%s2491_s4 + $0xd0] ss:$8 sps:$4 sm:$0xff]   ;;  %v1837_v46 = vld [vmem:[%s2491_s4 + $0xe4] ss:$8 sps:$4 sm:$0xff]   ;;  %v1839_v47 = vld [vmem:[%s2491_s4 + $0xe0] ss:$8 sps:$4 sm:$0xff]  }
  0x16   : > { %v1840_v48 = vld [vmem:[%s2491_s4 + $0xf4] ss:$8 sps:$4 sm:$0xff]   ;;  %v1842_v49 = vld [vmem:[%s2491_s4 + $0xf0] ss:$8 sps:$4 sm:$0xff]   ;;  %v1843_v50 = vld [vmem:[%s2493_s6] ss:$8 sps:$4 sm:$0xff]  }
  0x17   : > { %523 = vmatpush1.bf16.msra.mxu0 %v1784_v13  ;;  %794 = vmatpush1.bf16.msra.mxu1 %v1806_v22  ;;  %v1845_v51 = vld [vmem:[%s2493_s6 + $0x4] ss:$8 sps:$4 sm:$0xff]   ;;  %v1848_v52 = vld [vmem:[%s2493_s6 + $0x14] ss:$8 sps:$4 sm:$0xff]   ;;  %v1846_v53 = vld [vmem:[%s2493_s6 + $0x10] ss:$8 sps:$4 sm:$0xff]  }
  0x18   : > { %524 = vmatprep.subr.bf16.mxu0 %v1785_v15  ;;  %795 = vmatprep.subr.bf16.mxu1 %v1807_v24  ;;  %v1851_v54 = vld [vmem:[%s2493_s6 + $0x24] ss:$8 sps:$4 sm:$0xff]   ;;  %v1849_v55 = vld [vmem:[%s2493_s6 + $0x20] ss:$8 sps:$4 sm:$0xff]   ;;  %v1854_v56 = vld [vmem:[%s2493_s6 + $0x34] ss:$8 sps:$4 sm:$0xff]  }
  0x19   : > { %v1852_v57 = vld [vmem:[%s2493_s6 + $0x30] ss:$8 sps:$4 sm:$0xff]   ;;  %v1857_v58 = vld [vmem:[%s2493_s6 + $0x44] ss:$8 sps:$4 sm:$0xff]   ;;  %v1855_v59 = vld [vmem:[%s2493_s6 + $0x40] ss:$8 sps:$4 sm:$0xff]  }
  0x1a   : > { %v1860_v60 = vld [vmem:[%s2493_s6 + $0x54] ss:$8 sps:$4 sm:$0xff]   ;;  %v1858_v61 = vld [vmem:[%s2493_s6 + $0x50] ss:$8 sps:$4 sm:$0xff]   ;;  %v1863_v62 = vld [vmem:[%s2493_s6 + $0x64] ss:$8 sps:$4 sm:$0xff]  }
  0x1b   : > { %525 = vmatpush1.bf16.msra.mxu0 %v1787_v17  ;;  %796 = vmatpush1.bf16.msra.mxu1 %v1809_v26  ;;  %v1861_v63 = vld [vmem:[%s2493_s6 + $0x60] ss:$8 sps:$4 sm:$0xff]   ;;  %v1866_v0 = vld [vmem:[%s2493_s6 + $0x74] ss:$8 sps:$4 sm:$0xff]   ;;  %v1864_v1 = vld [vmem:[%s2493_s6 + $0x70] ss:$8 sps:$4 sm:$0xff]  }
  0x1c   : > { %526 = vmatprep.subr.bf16.mxu0 %v1788_v19  ;;  %797 = vmatprep.subr.bf16.mxu1 %v1810_v28  ;;  %v1869_v2 = vld [vmem:[%s2493_s6 + $0x84] ss:$8 sps:$4 sm:$0xff]   ;;  %v1867_v3 = vld [vmem:[%s2493_s6 + $0x80] ss:$8 sps:$4 sm:$0xff]   ;;  %v1872_v4 = vld [vmem:[%s2493_s6 + $0x94] ss:$8 sps:$4 sm:$0xff]  }
  0x1d   : > { %v1870_v5 = vld [vmem:[%s2493_s6 + $0x90] ss:$8 sps:$4 sm:$0xff]   ;;  %v1875_v6 = vld [vmem:[%s2493_s6 + $0xa4] ss:$8 sps:$4 sm:$0xff]   ;;  %v1873_v7 = vld [vmem:[%s2493_s6 + $0xa0] ss:$8 sps:$4 sm:$0xff]  }
  0x1e   : > { %v1878_v8 = vld [vmem:[%s2493_s6 + $0xb4] ss:$8 sps:$4 sm:$0xff]   ;;  %v1876_v9 = vld [vmem:[%s2493_s6 + $0xb0] ss:$8 sps:$4 sm:$0xff]   ;;  %v1881_v10 = vld [vmem:[%s2493_s6 + $0xc4] ss:$8 sps:$4 sm:$0xff]  }
  0x1f   : > { %527 = vmatpush1.bf16.msra.mxu0 %v1790_v21  ;;  %798 = vmatpush1.bf16.msra.mxu1 %v1812_v29  ;;  %v1879_v11 = vld [vmem:[%s2493_s6 + $0xc0] ss:$8 sps:$4 sm:$0xff]   ;;  %v1884_v12 = vld [vmem:[%s2493_s6 + $0xd4] ss:$8 sps:$4 sm:$0xff]   ;;  %v1882_v13 = vld [vmem:[%s2493_s6 + $0xd0] ss:$8 sps:$4 sm:$0xff]  }
  0x20   : > { %528 = vmatprep.subr.bf16.mxu0 %v1791_v23  ;;  %799 = vmatprep.subr.bf16.mxu1 %v1813_v30  ;;  %s558_s13 = scalar_select %p397_p5, 1, 0  ;;  %v419_v15 = vshrl.u32 %v418_v14, 7  ;;  %v557_v16 = vld [vmem:[%s2488_s1] sm:$0x3] }
  0x21   : > { %v416_v19 = vld [vmem:[%s2490_s3] sm:$0x3] }
  0x22   : > { %s559_s14 = scvt.s32.f32 %s558_s13  ;;  %v2291_v18 = vsub.s32 0, %v419_v15  ;;  %v2296_v20 = vsub.s32 1, %v419_v15 }
  0x23   : > { %529 = vmatpush1.bf16.msra.mxu0 %v1793_v25  ;;  %800 = vmatpush1.bf16.msra.mxu1 %v1815_v31 }
  0x24   : > { %801 = vmatprep.subr.bf16.mxu1 %v1816_v32  ;;  %1040 = vmatprep.subr.bf16.mxu0 %v1845_v51  ;;  %v560_v17 = vstv %s559_s14  ;;  %v421_v22 = vrot.slane %v416_v19, %v2291_v18  ;;  %v425_v23 = vrot.slane %v416_v19, %v2296_v20  ;;  %v1894_v51 = vld [vmem:[%s2495_s8 + $0x10] ss:$8 sps:$4 sm:$0xff]  }
  0x25   : > { %v561_v21 = vmul.f32 %v560_v17, %v557_v16 }
  0x26   : > { %547 = vmatmul.mubr.bf16.vlgmr.msra.gmra.mrb[0].mxu0 %v1794_v27 }
  0x27   : > { %802 = vmatpush1.bf16.msra.mxu1 %v1818_v33  ;;  %1041 = vmatpush1.bf16.msra.mxu0 %v1843_v50  ;;  %v566_v24 = vrot.slane %v561_v21, %v2291_v18  ;;  %v570_v26 = vrot.slane %v561_v21, %v2296_v20  ;;  %v1896_v50 = vld [vmem:[%s2495_s8 + $0x14] ss:$8 sps:$4 sm:$0xff]  }
  0x28   : > { %803 = vmatprep.subr.bf16.mxu1 %v1819_v34  ;;  %1042 = vmatprep.subr.bf16.mxu0 %v1848_v52  ;;  %v1899_v52 = vld [vmem:[%s2495_s8 + $0x24] ss:$8 sps:$4 sm:$0xff]  }
  0x2b   : > { %804 = vmatpush1.bf16.msra.mxu1 %v1821_v35  ;;  %1043 = vmatpush1.bf16.msra.mxu0 %v1846_v53  ;;  %v1897_v53 = vld [vmem:[%s2495_s8 + $0x20] ss:$8 sps:$4 sm:$0xff]  }
  0x2c   : > { %805 = vmatprep.subr.bf16.mxu1 %v1822_v36  ;;  %1044 = vmatprep.subr.bf16.mxu0 %v1851_v54  ;;  %v1902_v54 = vld [vmem:[%s2495_s8 + $0x34] ss:$8 sps:$4 sm:$0xff]  }
  0x2f   : > { %806 = vmatpush1.bf16.msra.mxu1 %v1824_v37  ;;  %1045 = vmatpush1.bf16.msra.mxu0 %v1849_v55  ;;  %v1900_v55 = vld [vmem:[%s2495_s8 + $0x30] ss:$8 sps:$4 sm:$0xff]  }
  0x30   : > { %807 = vmatprep.subr.bf16.mxu1 %v1825_v38  ;;  %1046 = vmatprep.subr.bf16.mxu0 %v1854_v56  ;;  %v1905_v56 = vld [vmem:[%s2495_s8 + $0x44] ss:$8 sps:$4 sm:$0xff]  }
  0x33   : > { %808 = vmatpush1.bf16.msra.mxu1 %v1827_v39  ;;  %1047 = vmatpush1.bf16.msra.mxu0 %v1852_v57  ;;  %v1903_v57 = vld [vmem:[%s2495_s8 + $0x40] ss:$8 sps:$4 sm:$0xff]  }
  0x34   : > { %809 = vmatprep.subr.bf16.mxu1 %v1828_v40  ;;  %1048 = vmatprep.subr.bf16.mxu0 %v1857_v58  ;;  %v1908_v58 = vld [vmem:[%s2495_s8 + $0x54] ss:$8 sps:$4 sm:$0xff]  }
  0x37   : > { %810 = vmatpush1.bf16.msra.mxu1 %v1830_v41  ;;  %1049 = vmatpush1.bf16.msra.mxu0 %v1855_v59  ;;  %v1906_v59 = vld [vmem:[%s2495_s8 + $0x50] ss:$8 sps:$4 sm:$0xff]  }
  0x38   : > { %811 = vmatprep.subr.bf16.mxu1 %v1831_v42  ;;  %1050 = vmatprep.subr.bf16.mxu0 %v1860_v60  ;;  %v1911_v60 = vld [vmem:[%s2495_s8 + $0x64] ss:$8 sps:$4 sm:$0xff]  }
  0x3b   : > { %812 = vmatpush1.bf16.msra.mxu1 %v1833_v43  ;;  %1051 = vmatpush1.bf16.msra.mxu0 %v1858_v61  ;;  %v1909_v61 = vld [vmem:[%s2495_s8 + $0x60] ss:$8 sps:$4 sm:$0xff]  }
  0x3c   : > { %813 = vmatprep.subr.bf16.mxu1 %v1834_v44  ;;  %1052 = vmatprep.subr.bf16.mxu0 %v1863_v62  ;;  %v1887_v44 = vld [vmem:[%s2493_s6 + $0xe4] ss:$8 sps:$4 sm:$0xff]   ;;  %v1914_v62 = vld [vmem:[%s2495_s8 + $0x74] ss:$8 sps:$4 sm:$0xff]  }
  0x3f   : > { %814 = vmatpush1.bf16.msra.mxu1 %v1836_v45  ;;  %1053 = vmatpush1.bf16.msra.mxu0 %v1861_v63  ;;  %v1885_v45 = vld [vmem:[%s2493_s6 + $0xe0] ss:$8 sps:$4 sm:$0xff]   ;;  %v1912_v63 = vld [vmem:[%s2495_s8 + $0x70] ss:$8 sps:$4 sm:$0xff]  }
  0x40   : > { %815 = vmatprep.subr.bf16.mxu1 %v1837_v46  ;;  %1054 = vmatprep.subr.bf16.mxu0 %v1866_v0  ;;  %v1890_v46 = vld [vmem:[%s2493_s6 + $0xf4] ss:$8 sps:$4 sm:$0xff]   ;;  %v1917_v0 = vld [vmem:[%s2495_s8 + $0x84] ss:$8 sps:$4 sm:$0xff]  }
  0x43   : > { %816 = vmatpush1.bf16.msra.mxu1 %v1839_v47  ;;  %1055 = vmatpush1.bf16.msra.mxu0 %v1864_v1  ;;  %v1888_v47 = vld [vmem:[%s2493_s6 + $0xf0] ss:$8 sps:$4 sm:$0xff]   ;;  %v1915_v1 = vld [vmem:[%s2495_s8 + $0x80] ss:$8 sps:$4 sm:$0xff]  }
  0x44   : > { %817 = vmatprep.subr.bf16.mxu1 %v1840_v48  ;;  %1056 = vmatprep.subr.bf16.mxu0 %v1869_v2  ;;  %v1891_v48 = vld [vmem:[%s2495_s8] ss:$8 sps:$4 sm:$0xff]   ;;  %v1920_v2 = vld [vmem:[%s2495_s8 + $0x94] ss:$8 sps:$4 sm:$0xff]  }
  0x47   : > { %818 = vmatpush1.bf16.msra.mxu1 %v1842_v49  ;;  %1057 = vmatpush1.bf16.msra.mxu0 %v1867_v3  ;;  %v1893_v49 = vld [vmem:[%s2495_s8 + $0x4] ss:$8 sps:$4 sm:$0xff]   ;;  %v1918_v3 = vld [vmem:[%s2495_s8 + $0x90] ss:$8 sps:$4 sm:$0xff]  }
  0x48   : > { %1058 = vmatprep.subr.bf16.mxu0 %v1872_v4  ;;  %1293 = vmatprep.subr.bf16.mxu1 %v1893_v49  ;;  %v1923_v4 = vld [vmem:[%s2495_s8 + $0xa4] ss:$8 sps:$4 sm:$0xff]  }
  0x4b   : > { %1059 = vmatpush1.bf16.msra.mxu0 %v1870_v5  ;;  %v1921_v5 = vld [vmem:[%s2495_s8 + $0xa0] ss:$8 sps:$4 sm:$0xff]  }
  0x4c   : > { %1060 = vmatprep.subr.bf16.mxu0 %v1875_v6  ;;  %v1926_v6 = vld [vmem:[%s2495_s8 + $0xb4] ss:$8 sps:$4 sm:$0xff]  }
  0x4f   : > { %1061 = vmatpush1.bf16.msra.mxu0 %v1873_v7  ;;  %v1924_v7 = vld [vmem:[%s2495_s8 + $0xb0] ss:$8 sps:$4 sm:$0xff]  }
  0x50   : > { %1062 = vmatprep.subr.bf16.mxu0 %v1878_v8  ;;  %v1929_v8 = vld [vmem:[%s2495_s8 + $0xc4] ss:$8 sps:$4 sm:$0xff]  }
  0x53   : > { %1063 = vmatpush1.bf16.msra.mxu0 %v1876_v9  ;;  %v1927_v9 = vld [vmem:[%s2495_s8 + $0xc0] ss:$8 sps:$4 sm:$0xff]  }
  0x54   : > { %1064 = vmatprep.subr.bf16.mxu0 %v1881_v10  ;;  %v1932_v10 = vld [vmem:[%s2495_s8 + $0xd4] ss:$8 sps:$4 sm:$0xff]  }
  0x57   : > { %1065 = vmatpush1.bf16.msra.mxu0 %v1879_v11  ;;  %v1930_v11 = vld [vmem:[%s2495_s8 + $0xd0] ss:$8 sps:$4 sm:$0xff]  }
  0x58   : > { %1066 = vmatprep.subr.bf16.mxu0 %v1884_v12  ;;  %v615_v12 = vld [vmem:[%s2492_s5] sm:$0x3] }
  0x59   : > { %v624_v14 = vrot.slane %v615_v12, %v2296_v20 }
  0x5b   : > { %1067 = vmatpush1.bf16.msra.mxu0 %v1882_v13  ;;  %v620_v13 = vrot.slane %v615_v12, %v2291_v18 }
  0x5c   : > { %1068 = vmatprep.subr.bf16.mxu0 %v1887_v44  ;;  %v1948_v44 = vld [vmem:[%s2497_s10 + $0x20] sm:$0xff]  }
  0x5f   : > { %1069 = vmatpush1.bf16.msra.mxu0 %v1885_v45  ;;  %v1949_v45 = vld [vmem:[%s2497_s10 + $0x68] sm:$0xff]  }
  0x60   : > { %1070 = vmatprep.subr.bf16.mxu0 %v1890_v46  ;;  %v868_v46 = vld [vmem:[%s2494_s7] sm:$0x3] }
  0x63   : > { %1071 = vmatpush1.bf16.msra.mxu0 %v1888_v47  ;;  %v873_v47 = vrot.slane %v868_v46, %v2291_v18 }
  0xf9   : > { %v548_v25 = vpop.f32.mrb[0].mxu0 }
  0xfa   : > { %v549_v27 = vadd.f32 %v548_v25, %v421_v22  ;;  %v550_v28 = vpop.f32.mrb[1].mxu0 }
  0xfb   : > { %v551_v29 = vadd.f32 %v550_v28, %v425_v23  ;;  %v552_v30 = vpop.f32.mrb[2].mxu0 }
  0xfc   : > { %v573_v31 = vadd.f32 %v566_v24, %v549_v27  ;;  %v553_v32 = vadd.f32 %v552_v30, %v421_v22  ;;  %v554_v33 = vpop.f32.mrb[3].mxu0 }
  0xfd   : > { %v555_v34 = vadd.f32 %v554_v33, %v425_v23  ;;  %v574_v35 = vadd.f32 %v570_v26, %v551_v29  ;;  %v1938_v33 = vld [vmem:[%s2495_s8 + $0xf4] ss:$8 sps:$4 sm:$0xff]  }
  0xfe   : > { %v575_v36 = vadd.f32 %v566_v24, %v553_v32  ;;  %v577_v38 = vmax.f32 %v573_v31, 0.0  ;;  %v1935_v31 = vld [vmem:[%s2495_s8 + $0xe4] ss:$8 sps:$4 sm:$0xff]   ;;  %v1933_v32 = vld [vmem:[%s2495_s8 + $0xe0] ss:$8 sps:$4 sm:$0xff]  }
  0xff   : > { %v576_v37 = vadd.f32 %v570_v26, %v555_v34  ;;  %v578_v40 = vmax.f32 %v574_v35, 0.0  ;;  %v1936_v34 = vld [vmem:[%s2495_s8 + $0xf0] ss:$8 sps:$4 sm:$0xff]   ;;  %v1939_v35 = vld [vmem:[%s2497_s10 + $0x40] sm:$0xff]  }
 0x100   : > { %v579_v39 = vmax.f32 %v575_v36, 0.0  ;;  %v1940_v36 = vld [vmem:[%s2497_s10] sm:$0xff]   ;;  %1739 = vmatprep.subr.bf16.mxu0 %v1939_v35 }
 0x101   : > { %v580_v41 = vmax.f32 %v576_v37, 0.0  ;;  %v1941_v37 = vld [vmem:[%s2497_s10 + $0x48] sm:$0xff]  }
 0x102   : > { %v581_v42 = vpack.c.bf16 %v579_v39, %v577_v38  ;;  %v1942_v38 = vld [vmem:[%s2497_s10 + $0x8] sm:$0xff]   ;;  %v1943_v39 = vld [vmem:[%s2497_s10 + $0x50] sm:$0xff]  }
 0x103   : > { %v582_v43 = vpack.c.bf16 %v580_v41, %v578_v40  ;;  %v1944_v40 = vld [vmem:[%s2497_s10 + $0x10] sm:$0xff]   ;;  %v1945_v41 = vld [vmem:[%s2497_s10 + $0x58] sm:$0xff]  }
 0x105   : > { %819 = vmatprep.mubr.bf16.mxu1 %v582_v43  ;;  %v1947_v43 = vld [vmem:[%s2497_s10 + $0x60] sm:$0xff]  }
 0x106   : > { %820 = vmatmul.mubr.bf16.vlgmr.msra.gmra.mrb[0].mxu1 %v581_v42  ;;  %v1946_v42 = vld [vmem:[%s2497_s10 + $0x18] sm:$0xff]  }
 0x107   : > { %1294 = vmatpush1.bf16.msra.mxu1 %v1891_v48  ;;  %v877_v48 = vrot.slane %v868_v46, %v2296_v20 }
 0x108   : > { %1295 = vmatprep.subr.bf16.mxu1 %v1896_v50 }
 0x10b   : > { %1296 = vmatpush1.bf16.msra.mxu1 %v1894_v51 }
 0x10c   : > { %1297 = vmatprep.subr.bf16.mxu1 %v1899_v52 }
 0x10f   : > { %1298 = vmatpush1.bf16.msra.mxu1 %v1897_v53 }
 0x110   : > { %1299 = vmatprep.subr.bf16.mxu1 %v1902_v54 }
 0x113   : > { %1300 = vmatpush1.bf16.msra.mxu1 %v1900_v55 }
 0x114   : > { %1301 = vmatprep.subr.bf16.mxu1 %v1905_v56 }
 0x117   : > { %1302 = vmatpush1.bf16.msra.mxu1 %v1903_v57 }
 0x118   : > { %1303 = vmatprep.subr.bf16.mxu1 %v1908_v58 }
 0x11b   : > { %1304 = vmatpush1.bf16.msra.mxu1 %v1906_v59 }
 0x11c   : > { %1305 = vmatprep.subr.bf16.mxu1 %v1911_v60 }
 0x11f   : > { %1306 = vmatpush1.bf16.msra.mxu1 %v1909_v61 }
 0x120   : > { %1307 = vmatprep.subr.bf16.mxu1 %v1914_v62 }
 0x123   : > { %1308 = vmatpush1.bf16.msra.mxu1 %v1912_v63  ;;  %v1950_v63 = vld [vmem:[%s2497_s10 + $0x28] sm:$0xff]  }
 0x124   : > { %1309 = vmatprep.subr.bf16.mxu1 %v1917_v0  ;;  %v1951_v0 = vld [vmem:[%s2497_s10 + $0x70] sm:$0xff]  }
 0x127   : > { %1310 = vmatpush1.bf16.msra.mxu1 %v1915_v1  ;;  %v1952_v1 = vld [vmem:[%s2497_s10 + $0x30] sm:$0xff]  }
 0x128   : > { %1311 = vmatprep.subr.bf16.mxu1 %v1920_v2  ;;  %v1953_v2 = vld [vmem:[%s2497_s10 + $0x78] sm:$0xff]  }
 0x12b   : > { %1312 = vmatpush1.bf16.msra.mxu1 %v1918_v3  ;;  %v1954_v3 = vld [vmem:[%s2497_s10 + $0x38] sm:$0xff]  }
 0x12c   : > { %1313 = vmatprep.subr.bf16.mxu1 %v1923_v4  ;;  %v1121_v4 = vld [vmem:[%s2496_s9] sm:$0x3] }
 0x12f   : > { %1314 = vmatpush1.bf16.msra.mxu1 %v1921_v5  ;;  %v1126_v5 = vrot.slane %v1121_v4, %v2291_v18  ;;  %v1719_v18 = vld [vmem:[%s2498_s11] ss:$0 sm:$0xff] }
 0x130   : > { %1315 = vmatprep.subr.bf16.mxu1 %v1926_v6  ;;  %v1130_v6 = vrot.slane %v1121_v4, %v2296_v20 }
 0x133   : > { %1316 = vmatpush1.bf16.msra.mxu1 %v1924_v7 }
 0x134   : > { %1317 = vmatprep.subr.bf16.mxu1 %v1929_v8 }
 0x137   : > { %1318 = vmatpush1.bf16.msra.mxu1 %v1927_v9 }
 0x138   : > { %1319 = vmatprep.subr.bf16.mxu1 %v1932_v10 }
 0x13b   : > { %1320 = vmatpush1.bf16.msra.mxu1 %v1930_v11 }
 0x13c   : > { %1321 = vmatprep.subr.bf16.mxu1 %v1935_v31 }
 0x13f   : > { %1322 = vmatpush1.bf16.msra.mxu1 %v1933_v32 }
 0x140   : > { %1323 = vmatprep.subr.bf16.mxu1 %v1938_v33 }
 0x143   : > { %1324 = vmatpush1.bf16.msra.mxu1 %v1936_v34 }
 0x1d9   : > { %v821_v15 = vpop.f32.mrb[0].mxu1 }
 0x1da   : > { %v822_v16 = vadd.f32 %v821_v15, %v620_v13  ;;  %v823_v17 = vpop.f32.mrb[1].mxu1 }
 0x1db   : > { %v824_v19 = vadd.f32 %v823_v17, %v624_v14  ;;  %v825_v21 = vpop.f32.mrb[2].mxu1 }
 0x1dc   : > { %v826_v22 = vadd.f32 %v825_v21, %v620_v13  ;;  %v827_v23 = vpop.f32.mrb[3].mxu1  ;;  %v830_v25 = vmax.f32 %v822_v16, 0.0 }
 0x1dd   : > { %v828_v24 = vadd.f32 %v827_v23, %v624_v14  ;;  %v831_v27 = vmax.f32 %v824_v19, 0.0 }
 0x1de   : > { %v832_v26 = vmax.f32 %v826_v22, 0.0 }
 0x1df   : > { %v833_v28 = vmax.f32 %v828_v24, 0.0 }
 0x1e0   : > { %v834_v29 = vpack.c.bf16 %v832_v26, %v830_v25 }
 0x1e1   : > { %v835_v30 = vpack.c.bf16 %v833_v28, %v831_v27 }
 0x1e3   : > { %1072 = vmatprep.mubr.bf16.mxu0 %v835_v30 }
 0x1e4   : > { %1073 = vmatmul.mubr.bf16.vlgmr.msra.gmra.mrb[4].mxu0 %v834_v29 }
 0x1e5   : > { %1740 = vmatpush3.bf16.msra.mxu0 %v1940_v36 }
 0x1e6   : > { %1741 = vmatprep.subr.bf16.mxu0 %v1941_v37 }
 0x1e9   : > { %1742 = vmatpush3.bf16.msra.mxu0 %v1942_v38 }
 0x1ea   : > { %1743 = vmatprep.subr.bf16.mxu0 %v1943_v39 }
 0x1ed   : > { %1744 = vmatpush3.bf16.msra.mxu0 %v1944_v40 }
 0x1ee   : > { %1745 = vmatprep.subr.bf16.mxu0 %v1945_v41 }
 0x1f1   : > { %1746 = vmatpush3.bf16.msra.mxu0 %v1946_v42 }
 0x1f2   : > { %1747 = vmatprep.subr.bf16.mxu0 %v1947_v43 }
 0x1f5   : > { %1748 = vmatpush3.bf16.msra.mxu0 %v1948_v44 }
 0x1f6   : > { %1749 = vmatprep.subr.bf16.mxu0 %v1949_v45 }
 0x1f9   : > { %1750 = vmatpush3.bf16.msra.mxu0 %v1950_v63 }
 0x1fa   : > { %1751 = vmatprep.subr.bf16.mxu0 %v1951_v0 }
 0x1fd   : > { %1752 = vmatpush3.bf16.msra.mxu0 %v1952_v1 }
 0x1fe   : > { %1753 = vmatprep.subr.bf16.mxu0 %v1953_v2 }
 0x201   : > { %1754 = vmatpush3.bf16.msra.mxu0 %v1954_v3 }
 0x2b7   : > { %v1074_v49 = vpop.f32.mrb[4].mxu0 }
 0x2b8   : > { %v1075_v50 = vadd.f32 %v1074_v49, %v873_v47  ;;  %v1076_v51 = vpop.f32.mrb[5].mxu0 }
 0x2b9   : > { %v1077_v52 = vadd.f32 %v1076_v51, %v877_v48  ;;  %v1078_v53 = vpop.f32.mrb[6].mxu0 }
 0x2ba   : > { %v1079_v54 = vadd.f32 %v1078_v53, %v873_v47  ;;  %v1080_v55 = vpop.f32.mrb[7].mxu0  ;;  %v1083_v57 = vmax.f32 %v1075_v50, 0.0 }
 0x2bb   : > { %v1081_v56 = vadd.f32 %v1080_v55, %v877_v48  ;;  %v1084_v59 = vmax.f32 %v1077_v52, 0.0 }
 0x2bc   : > { %v1085_v58 = vmax.f32 %v1079_v54, 0.0 }
 0x2bd   : > { %v1086_v60 = vmax.f32 %v1081_v56, 0.0 }
 0x2be   : > { %v1087_v61 = vpack.c.bf16 %v1085_v58, %v1083_v57 }
 0x2bf   : > { %v1088_v62 = vpack.c.bf16 %v1086_v60, %v1084_v59 }
 0x2c1   : > { %1325 = vmatprep.mubr.bf16.mxu1 %v1088_v62 }
 0x2c2   : > { %1326 = vmatmul.mubr.bf16.vlgmr.msra.gmra.mrb[4].mxu1 %v1087_v61 }
 0x395   : > { %v1327_v7 = vpop.f32.mrb[4].mxu1 }
 0x396   : > { %v1328_v8 = vadd.f32 %v1327_v7, %v1126_v5  ;;  %v1329_v9 = vpop.f32.mrb[5].mxu1 }
 0x397   : > { %v1330_v10 = vadd.f32 %v1329_v9, %v1130_v6  ;;  %v1331_v11 = vpop.f32.mrb[6].mxu1 }
 0x398   : > { %v1332_v12 = vadd.f32 %v1331_v11, %v1126_v5  ;;  %v1333_v13 = vpop.f32.mrb[7].mxu1  ;;  %v1336_v15 = vmax.f32 %v1328_v8, 0.0 }
 0x399   : > { %v1334_v14 = vadd.f32 %v1333_v13, %v1130_v6  ;;  %v1337_v17 = vmax.f32 %v1330_v10, 0.0 }
 0x39a   : > { %v1338_v16 = vmax.f32 %v1332_v12, 0.0 }
 0x39b   : > { %v1339_v19 = vmax.f32 %v1334_v14, 0.0 }
 0x39c   : > { %v1340_v21 = vpack.c.bf16 %v1338_v16, %v1336_v15 }
 0x39d   : > { %v1341_v22 = vpack.c.bf16 %v1339_v19, %v1337_v17 }
 0x39f   : > { %1509 = vmatprep.mubr.bf16.mxu0 %v1341_v22 }
 0x3a0   : > { %1510 = vmatmul.mubr.bf16.vlgmr.msra.gmra.mrb[8].mxu0 %v1340_v21 }
 0x473   : > { %v1755_v23 = vpop.f32.mrb[8].mxu0  ;;  %1520 = sbr.rel (%p397_p5) target bundleno = 1148 (0x47c), region = 72 }
 0x474   : > { %v1756_v20 = vpop.f32.mrb[9].mxu0 }
 0x475   : > { %v1757_v24 = vadd.f32 %v1756_v20, %v1755_v23  ;;  %v1758_v25 = vpop.f32.mrb[10].mxu0 }
 0x476   : > { %v1759_v26 = vpop.f32.mrb[11].mxu0 }
 0x477   : > { %v1512_v27 = vadd.f32 %v1757_v24, %v1719_v18  ;;  %v1760_v28 = vadd.f32 %v1759_v26, %v1758_v25 }
 0x479   : > { %v1515_v29 = vadd.f32 %v1760_v28, %v1719_v18  ;;  %1521 = vst [vmem:[%s2067_s19] sm:$0xff] (!%p397_p5), %v1512_v27 }
 0x47b   : > { %1522 = vst [vmem:[%s2067_s19 + $0x8] sm:$0xff] %v1515_v29 }
 0x47c PF: > { %1525 = sbr.rel (%p396_p3) target bundleno = 1182 (0x49e), region = 76  ;;  %v1528_v30 = vmin.f32 (!%p396_p3), %v1512_v27, 20.0  ;;  %v1529_v31 = vmin.f32 (!%p396_p3), %v1515_v29, 20.0  ;;  %vm1526_vm1 = vcmp.gt.f32.partialorder (!%p396_p3), %v1512_v27, 20.0  ;;  %vm1527_vm3 = vcmp.gt.f32.partialorder (!%p396_p3), %v1515_v29, 20.0 }
 0x47e   : > { %v1530_v32 = vmul.f32 (!%p396_p3), 1.442695, %v1528_v30  ;;  %v1532_v33 = vmul.f32 (!%p396_p3), 1.442695, %v1529_v31 }
 0x480   : > { %1955 = vpow2.f32 (!%p396_p3), %v1530_v32 }
 0x481   : > { %1957 = vpow2.f32 (!%p396_p3), %v1532_v33 }
 0x48a   : > { %v1956_v34 = vpop.eup %1955 }
 0x48b   : > { %v1958_v35 = vpop.eup %1957  ;;  %v1534_v36 = vadd.f32 1.0, %v1956_v34  ;;  %v1537_v38 = vmul.f32 -0.5, %v1956_v34  ;;  %v1540_v41 = vand.u32 2147483647, %v1956_v34 }
 0x48c   : > { %v1543_v37 = vadd.f32 1.0, %v1958_v35  ;;  %v1546_v39 = vmul.f32 -0.5, %v1958_v35  ;;  %v1549_v43 = vand.u32 2147483647, %v1958_v35 }
 0x48d   : > { %1959 = vlog2.f32 %v1534_v36  ;;  %v1538_v40 = vadd.f32 1.0, %v1537_v38  ;;  %vm1541_vm0 = vcmp.lt.f32.partialorder %v1540_v41, 0.0004427343 }
 0x48e   : > { %1961 = vlog2.f32 %v1543_v37  ;;  %v1547_v42 = vadd.f32 1.0, %v1546_v39  ;;  %vm1550_vm2 = vcmp.lt.f32.partialorder %v1549_v43, 0.0004427343 }
 0x48f   : > { %v1539_v44 = vmul.f32 %v1956_v34, %v1538_v40 }
 0x490   : > { %v1548_v46 = vmul.f32 %v1958_v35, %v1547_v42 }
 0x497   : > { %v1960_v45 = vpop.eup %1959 }
 0x498   : > { %v1962_v47 = vpop.eup %1961  ;;  %v1536_v48 = vmul.f32 0.6931472, %v1960_v45 }
 0x499   : > { %v1545_v49 = vmul.f32 0.6931472, %v1962_v47 }
 0x49a   : > { %v1542_v50 = vsel %vm1541_vm0, %v1539_v44, %v1536_v48 }
 0x49b   : > { %v1552_v51 = vsel %vm1526_vm1, %v1512_v27, %v1542_v50  ;;  %v1551_v52 = vsel %vm1550_vm2, %v1548_v46, %v1545_v49 }
 0x49c   : > { %1554 = vst [vmem:[%s2067_s19] sm:$0xff] %v1552_v51  ;;  %v1553_v53 = vsel %vm1527_vm3, %v1515_v29, %v1551_v52 }
 0x49d   : > { %1555 = vst [vmem:[%s2067_s19 + $0x8] sm:$0xff] %v1553_v53 }
 0x49e PF: > { %s22_s21 = sadd.s32 1, %s1969_s21  }
 0x49f   : > { %p19_p6 = scmp.ge.s32.totalorder %s22_s21, 4  }
 0x4a1   :  { %21 = sbr.rel (!%p19_p6) target bundleno = 1 (0x1), region = 103 }

</bundles_post_ra>
